<compile_context>
chip_gen: v5e
topology: v5e:2x2
jax: 0.10.0
libtpu: 0.0.40
codegen_flags: <defaults>
</compile_context>

<pallas_src>
import functools

import jax
import jax.numpy as jnp
from jax.experimental import pallas as pl
from jax.experimental.pallas import tpu as pltpu


def _round_up(x, mult):
    return ((x + mult - 1) // mult) * mult


def _default_row_tile():
    # v5e/v6e: 128 MiB VMEM -> 1024-row tiles pay off; v7x: 64 MiB -> 512.
    try:
        vmem = pltpu.get_tpu_info().vmem_capacity_bytes
    except Exception:
        vmem = 64 << 20
    return 1024 if vmem >= (96 << 20) else 512


# ---------------------------------------------------------------------------
# Pallas kernel: per row-tile, compute y = xb @ phi and x0 = y @ psi.
# ---------------------------------------------------------------------------
def _constant_sampling_kernel(xb_ref, phi_ref, psi_ref, y_ref, x0_ref):
    xb = xb_ref[...]                                       # (tm, n)      bf16
    y = jnp.dot(xb, phi_ref[...],
                preferred_element_type=jnp.float32)        # (tm, m_pad)  f32 acc
    y_ref[...] = y.astype(y_ref.dtype)
    x0 = jnp.dot(y.astype(psi_ref.dtype), psi_ref[...],
                 preferred_element_type=jnp.float32)       # (tm, n)      f32 acc
    x0_ref[...] = x0.astype(x0_ref.dtype)


def _sampling_and_recon_pallas(xb_flat, phi, psi, *, row_tile=None):
    """xb_flat: [R, n] bf16; phi: [n, m_pad] bf16; psi: [m_pad, n] bf16.

    Returns (y [R, m_pad] f32, x0 [R, n] f32).
    """
    R, n = xb_flat.shape
    m_pad = phi.shape[1]

    if row_tile is None:
        row_tile = _default_row_tile()
    # Never over-pad small problems; keep the tile a multiple of 16 rows
    # (bf16 sublane packing). With R > tile the grid has >= 2 steps, which
    # lets v7x shard the "parallel" axis across its 2 TensorCores.
    row_tile = max(16, min(row_tile, _round_up(R, 16)))
    R_pad = _round_up(R, row_tile)
    if R_pad != R:
        xb_flat = jnp.pad(xb_flat, ((0, R_pad - R), (0, 0)))
    grid = (R_pad // row_tile,)

    itm = jnp.dtype(xb_flat.dtype).itemsize
    cost = pl.CostEstimate(
        flops=4 * R_pad * n * m_pad,            # two matmuls
        transcendentals=0,
        bytes_accessed=(R_pad * n * itm + 2 * n * m_pad * itm   # xb, phi, psi in
                        + R_pad * m_pad * 4 + R_pad * n * 4),   # y, x0 out
    )

    out_shapes = (
        jax.ShapeDtypeStruct((R_pad, m_pad), jnp.float32),
        jax.ShapeDtypeStruct((R_pad, n), jnp.float32),
    )
    y, x0 = pl.pallas_call(
        _constant_sampling_kernel,
        out_shape=out_shapes,
        grid_spec=pltpu.PrefetchScalarGridSpec(
            num_scalar_prefetch=0,
            grid=grid,
            in_specs=[
                pl.BlockSpec((row_tile, n), lambda i: (i, 0)),      # x_blocks tile
                pl.BlockSpec((n, m_pad), lambda i: (0, 0)),         # phi (VMEM-resident)
                pl.BlockSpec((m_pad, n), lambda i: (0, 0)),         # psi (VMEM-resident)
            ],
            out_specs=[
                pl.BlockSpec((row_tile, m_pad), lambda i: (i, 0)),  # y tile
                pl.BlockSpec((row_tile, n), lambda i: (i, 0)),      # x0_blocks tile
            ],
        ),
        compiler_params=pltpu.CompilerParams(
            dimension_semantics=("parallel",),
            vmem_limit_bytes=48 * 1024 * 1024,
            allow_input_fusion=[True, False, False],
        ),
        cost_estimate=cost,
    )(xb_flat, phi, psi)

    if R_pad != R:
        y = y[:R]
        x0 = x0[:R]
    return y, x0


# ---------------------------------------------------------------------------
# Layout glue (plain JAX): the einops rearranges from the PyTorch module.
# ---------------------------------------------------------------------------
def space_to_depth(x, blk_size):
    # 'B C (h b1) (w b2) -> B h w (C b1 b2)'
    B, C, H, W = x.shape
    h, w = H // blk_size, W // blk_size
    x = x.reshape(B, C, h, blk_size, w, blk_size)
    x = jnp.transpose(x, (0, 2, 4, 1, 3, 5))
    return x.reshape(B, h, w, C * blk_size * blk_size)


def depth_to_space(xb, blk_size, C):
    # 'B h w (C b1 b2) -> B C (h b1) (w b2)'
    B, h, w, _ = xb.shape
    xb = xb.reshape(B, h, w, C, blk_size, blk_size)
    xb = jnp.transpose(xb, (0, 3, 1, 4, 2, 5))
    return xb.reshape(B, C, h * blk_size, w * blk_size)


class ConstantSamplingPallas:
    """JAX/Pallas port of ConstantSampling (deterministic synthetic phi/psi)."""

    def __init__(self, sr, blk_size=32, channels=1):
        self.sr = sr
        self.blk_size = blk_size
        self.channels = channels
        n = channels * blk_size * blk_size
        m = int(round(sr * n))
        self.n = n
        self.m = m

        # TODO(synk): load_phi_psi(blk_size, sr) is unavailable in-script; a
        # deterministic Gaussian measurement matrix stands in for it.
        key = jax.random.PRNGKey(42)
        matrix = jax.random.normal(key, (m, n), dtype=jnp.float32) / jnp.sqrt(
            jnp.float32(n))
        self.phi = matrix.T          # [n, m]   (nn.Parameter(matrix.T))
        self.psi = matrix            # [m, n]   (nn.Parameter(matrix))

        # Kernel-side operands: bf16, with m padded to a lane-dense multiple
        # of 128 (zero columns of phi / zero rows of psi; y is sliced back).
        m_pad = _round_up(m, 128)
        self.m_pad = m_pad
        phi_p = jnp.zeros((n, m_pad), jnp.float32).at[:, :m].set(self.phi)
        psi_p = jnp.zeros((m_pad, n), jnp.float32).at[:m, :].set(self.psi)
        self._phi_bf16 = phi_p.astype(jnp.bfloat16)
        self._psi_bf16 = psi_p.astype(jnp.bfloat16)

    @functools.partial(jax.jit, static_argnums=0)
    def forward(self, x):
        B, C, H, W = x.shape
        b = self.blk_size
        h, w = H // b, W // b
        n = self.n

        # bf16 activations (MXU-native); accumulation stays f32 in-kernel.
        xb = space_to_depth(x.astype(jnp.bfloat16), b)       # [B, h, w, n]
        xb_flat = xb.reshape(B * h * w, n)

        y_flat, x0_flat = _sampling_and_recon_pallas(
            xb_flat, self._phi_bf16, self._psi_bf16)

        y = y_flat[:, :self.m] if self.m_pad != self.m else y_flat
        y = y.reshape(B, h, w, self.m)
        x0 = depth_to_space(x0_flat.reshape(B, h, w, n), b, C)
        return {"x0": x0, "y": y}

    def projection(self, x):
        return self.forward(x)["x0"]


# ---------------------------------------------------------------------------
# Reference (pure JAX, same bf16-operand / f32-accumulate recipe) for checks.
# ---------------------------------------------------------------------------
def _reference_forward(x, phi, psi, blk_size):
    B, C, H, W = x.shape
    xb = space_to_depth(x, blk_size).astype(jnp.bfloat16)
    phi_b = phi.astype(jnp.bfloat16)
    psi_b = psi.astype(jnp.bfloat16)
    y = jnp.einsum("bhwn,nm->bhwm", xb, phi_b,
                   preferred_element_type=jnp.float32)
    x0b = jnp.einsum("bhwm,mn->bhwn", y.astype(jnp.bfloat16), psi_b,
                     preferred_element_type=jnp.float32)
    x0 = depth_to_space(x0b, blk_size, C)
    return {"x0": x0, "y": y}


if __name__ == "__main__":
    # Small shapes consistent with the module: blk_size=32 forces H, W >= 32.
    B, C, H, W = 2, 1, 64, 64
    sr = 0.25
    model = ConstantSamplingPallas(sr=sr, blk_size=32, channels=C)

    key = jax.random.PRNGKey(0)
    x = jax.random.normal(key, (B, C, H, W), dtype=jnp.float32)

    res = model.forward(x)
    jax.block_until_ready(res)

    ref = _reference_forward(x, model.phi, model.psi, model.blk_size)
    assert res["y"].shape == ref["y"].shape
    assert res["x0"].shape == (B, C, H, W)
    assert jnp.allclose(res["y"], ref["y"], atol=2e-2, rtol=2e-2)
    assert jnp.allclose(res["x0"], ref["x0"], atol=2e-2, rtol=2e-2)

    print("KERNEL_OK")
</pallas_src>

<mosaic_0001>
module attributes {stable_mosaic.version = 11 : i64} {
  func.func @_constant_sampling_kernel(%arg0: i32, %arg1: memref<16x1024xbf16, #tpu.memory_space<vmem>>, %arg2: memref<1024x256xbf16, #tpu.memory_space<vmem>>, %arg3: memref<256x1024xbf16, #tpu.memory_space<vmem>>, %arg4: memref<16x256xf32, #tpu.memory_space<vmem>>, %arg5: memref<16x1024xf32, #tpu.memory_space<vmem>>) attributes {dimension_semantics = [#tpu.dimension_semantics<parallel>], iteration_bounds = array<i64: 1>, scalar_prefetch = 0 : i64, scratch_operands = 0 : i64, tpu.core_type = #tpu.core_type<tc>, window_params = [{transform_indices = @transform_0, window_bounds = array<i64: 16, 1024>}, {pipeline_mode = #tpu.pipeline_mode<synchronous>, transform_indices = @transform_1, window_bounds = array<i64: 1024, 256>}, {pipeline_mode = #tpu.pipeline_mode<synchronous>, transform_indices = @transform_2, window_bounds = array<i64: 256, 1024>}, {transform_indices = @transform_3, window_bounds = array<i64: 16, 256>}, {transform_indices = @transform_4, window_bounds = array<i64: 16, 1024>}]} {
    %c0 = arith.constant 0 : index
    %c0_0 = arith.constant 0 : index
    %0 = vector.load %arg1[%c0, %c0_0] : memref<16x1024xbf16, #tpu.memory_space<vmem>>, vector<16x1024xbf16>
    %c0_1 = arith.constant 0 : index
    %c0_2 = arith.constant 0 : index
    %1 = vector.load %arg2[%c0_1, %c0_2] : memref<1024x256xbf16, #tpu.memory_space<vmem>>, vector<1024x256xbf16>
    %cst = arith.constant dense<0.000000e+00> : vector<16x256xf32>
    %2 = tpu.matmul %0, %1, %cst {dimension_numbers = #tpu.dot_dimension_numbers<[1], [0], [0], [1], [0, 0, 1, 1], [], []>} : vector<16x1024xbf16>, vector<1024x256xbf16>, vector<16x256xf32> -> vector<16x256xf32>
    %c0_3 = arith.constant 0 : index
    %c0_4 = arith.constant 0 : index
    %3 = vector.load %arg4[%c0_3, %c0_4] : memref<16x256xf32, #tpu.memory_space<vmem>>, vector<16x256xf32>
    tpu.vector_store %arg4[%c0_3, %c0_4], %2 {strides = array<i32>} : memref<16x256xf32, #tpu.memory_space<vmem>>, vector<16x256xf32>,
    %4 = arith.truncf %2 : vector<16x256xf32> to vector<16x256xbf16>
    %c0_5 = arith.constant 0 : index
    %c0_6 = arith.constant 0 : index
    %5 = vector.load %arg3[%c0_5, %c0_6] : memref<256x1024xbf16, #tpu.memory_space<vmem>>, vector<256x1024xbf16>
    %cst_7 = arith.constant dense<0.000000e+00> : vector<16x1024xf32>
    %6 = tpu.matmul %4, %5, %cst_7 {dimension_numbers = #tpu.dot_dimension_numbers<[1], [0], [0], [1], [0, 0, 1, 1], [], []>} : vector<16x256xbf16>, vector<256x1024xbf16>, vector<16x1024xf32> -> vector<16x1024xf32>
    %c0_8 = arith.constant 0 : index
    %c0_9 = arith.constant 0 : index
    %7 = vector.load %arg5[%c0_8, %c0_9] : memref<16x1024xf32, #tpu.memory_space<vmem>>, vector<16x1024xf32>
    tpu.vector_store %arg5[%c0_8, %c0_9], %6 {strides = array<i32>} : memref<16x1024xf32, #tpu.memory_space<vmem>>, vector<16x1024xf32>,
    return
  }
  func.func @transform_0(%arg0: i32) -> (i32, i32) {
    %c0_i32 = arith.constant 0 : i32
    %c0_i32_0 = arith.constant 0 : i32
    return %arg0, %c0_i32 : i32, i32
  }
  func.func @transform_1(%arg0: i32) -> (i32, i32) {
    %c0_i32 = arith.constant 0 : i32
    %c0_i32_0 = arith.constant 0 : i32
    %c0_i32_1 = arith.constant 0 : i32
    return %c0_i32, %c0_i32_0 : i32, i32
  }
  func.func @transform_2(%arg0: i32) -> (i32, i32) {
    %c0_i32 = arith.constant 0 : i32
    %c0_i32_0 = arith.constant 0 : i32
    %c0_i32_1 = arith.constant 0 : i32
    return %c0_i32, %c0_i32_0 : i32, i32
  }
  func.func @transform_3(%arg0: i32) -> (i32, i32) {
    %c0_i32 = arith.constant 0 : i32
    %c0_i32_0 = arith.constant 0 : i32
    return %arg0, %c0_i32 : i32, i32
  }
  func.func @transform_4(%arg0: i32) -> (i32, i32) {
    %c0_i32 = arith.constant 0 : i32
    %c0_i32_0 = arith.constant 0 : i32
    return %arg0, %c0_i32 : i32, i32
  }
}

</mosaic_0001>

<bundles_post_ra>
// kernel: forward.2
= control target key start
LH: loop header
LB: loop body
LE: loop exit
PB: predicated region body
PF: predicated region fallthrough
CT: control target
= control target key end

     0   :  { %s3908_s0 = inlined_call_operand.hbm [shape: bf16[1024,256], index: 0, kind: input, shape index: {}]   ;;  %s3909_s1 = inlined_call_operand.hbm [shape: bf16[256,1024], index: 1, kind: input, shape index: {}]   ;;  %s3910_s2 = inlined_call_operand.vmem [shape: bf16[8,1024], index: 2, kind: input, shape index: {}]   ;;  %s3911_s3 = inlined_call_operand.<no memory space> [shape: bf16[], index: 3, kind: input, shape index: {}]   ;;  %s3912_s4 = inlined_call_operand.vmem [shape: f32[16,256], index: 4, kind: output, shape index: {0}]   ;;  %s3913_s5 = inlined_call_operand.vmem [shape: f32[16,1024], index: 5, kind: output, shape index: {1}]  }
   0x1   :  { %v11_v0 = vstv %s3911_s3 }
   0x2   :  { %v3774_v1 = vunpack.i.l.bf16 %v11_v0 }
   0x3   :  { %16 = vsyncpa [#allocation8], 0  ;;  %s24_s22 = sshll.u32 %s3908_s0, 4  ;;  %s25_s22 = int_to_ptr.hbm [resolvable:$true] %s24_s22 }
   0x4   :  { %17 = vsyncpa [#allocation10], 0  ;;  %s3735_s23 = smov [#allocation7]   ;;  %s37_s27 = sshll.u32 %s3909_s1, 4  ;;  %s38_s27 = int_to_ptr.hbm [resolvable:$true] %s37_s27 }
   0x5   :  { %s26_s24 = sshll.u32 %s3735_s23, 4  ;;  %s3736_s28 = smov 128   ;;  %s27_s24 = int_to_ptr.vmem [resolvable:$true] %s26_s24 }
   0x6   :  { %s3737_s29 = smov 8   ;;  %s3738_s3 = smov [#allocation9]  }
   0x7   :  { %32 = dma.hbm_to_vmem [thread:$0]  %s25_s22, 16384, %s27_s24, [#allocation8], %s3736_s28, %s3736_s28, %s3737_s29  }
   0x8   :  { %s39_s30 = sshll.u32 %s3738_s3, 4  ;;  %s3739_s6 = smov 512   ;;  %s40_s30 = int_to_ptr.vmem [resolvable:$true] %s39_s30 }
   0x9   :  { %s3740_s7 = smov 32  }
   0xa   :  { %45 = dma.hbm_to_vmem [thread:$0]  %s38_s27, 16384, %s40_s30, [#allocation10], %s3739_s6, %s3739_s6, %s3740_s7  }
   0xb   :  { %3731 = dma.done.wait [#allocation8], 16384  }
   0xc   :  { %3732 = vsyncadd [#allocation8], 4294950912 }
   0xd   :  { %3733 = dma.done.wait [#allocation10], 16384  }
   0xe   :  { %3734 = vsyncadd [#allocation10], 4294950912  ;;  %v2397_v2 = vld [vmem:[#allocation7 + $0x70] sm:$0xf]  ;;  %v3386_v3 = vld [vmem:[#allocation7 + $0x74] sm:$0xf0] }
   0xf   :  { %v2461_v4 = vld [vmem:[#allocation7 + $0xf0] sm:$0xf]  ;;  %v2398_v5 = vor.u32 %v3386_v3, %v2397_v2  ;;  %v3402_v6 = vld [vmem:[#allocation7 + $0xf4] sm:$0xf0]  ;;  %v2389_v13 = vld [vmem:[#allocation7 + $0x60] sm:$0xf] }
  0x10   :  { %v2525_v7 = vld [vmem:[#allocation7 + $0x170] sm:$0xf]  ;;  %v3418_v8 = vld [vmem:[#allocation7 + $0x174] sm:$0xf0]  ;;  %v2462_v9 = vor.u32 %v3402_v6, %v2461_v4  ;;  %v3384_v15 = vld [vmem:[#allocation7 + $0x64] sm:$0xf0] }
  0x11   :  { %v2526_v10 = vor.u32 %v3418_v8, %v2525_v7  ;;  %v2589_v11 = vld [vmem:[#allocation7 + $0x1f0] sm:$0xf]  ;;  %v3434_v12 = vld [vmem:[#allocation7 + $0x1f4] sm:$0xf0]  ;;  %1052 = vmatpush.bf16.msra.mxu0 %v2398_v5  ;;  %v2453_v16 = vld [vmem:[#allocation7 + $0xe0] sm:$0xf]  ;;  %v2390_v18 = vor.u32 %v3384_v15, %v2389_v13 }
  0x12   :  { %v2590_v14 = vor.u32 %v3434_v12, %v2589_v11  ;;  %v3400_v17 = vld [vmem:[#allocation7 + $0xe4] sm:$0xf0]  ;;  %1066 = vmatpush.bf16.msra.mxu1 %v2462_v9  ;;  %v2517_v20 = vld [vmem:[#allocation7 + $0x160] sm:$0xf]  ;;  %v2381_v25 = vld [vmem:[#allocation7 + $0x50] sm:$0xf] }
  0x13   :  { %1080 = vmatpush.bf16.msra.mxu2 %v2526_v10  ;;  %v2454_v19 = vor.u32 %v3400_v17, %v2453_v16  ;;  %v3416_v21 = vld [vmem:[#allocation7 + $0x164] sm:$0xf0]  ;;  %v2581_v22 = vld [vmem:[#allocation7 + $0x1e0] sm:$0xf]  ;;  %v3382_v26 = vld [vmem:[#allocation7 + $0x54] sm:$0xf0] }
  0x14   :  { %1094 = vmatpush.bf16.msra.mxu3 %v2590_v14  ;;  %v2518_v23 = vor.u32 %v3416_v21, %v2517_v20  ;;  %v3432_v24 = vld [vmem:[#allocation7 + $0x1e4] sm:$0xf0]  ;;  %v2445_v28 = vld [vmem:[#allocation7 + $0xd0] sm:$0xf]  ;;  %v3398_v29 = vld [vmem:[#allocation7 + $0xd4] sm:$0xf0]  ;;  %v2382_v31 = vor.u32 %v3382_v26, %v2381_v25 }
  0x15   :  { %v2582_v27 = vor.u32 %v3432_v24, %v2581_v22  ;;  %v2509_v30 = vld [vmem:[#allocation7 + $0x150] sm:$0xf]  ;;  %1053 = vmatpush.bf16.msra.mxu0 %v2390_v18  ;;  %v3414_v32 = vld [vmem:[#allocation7 + $0x154] sm:$0xf0]  ;;  %v2446_v35 = vor.u32 %v3398_v29, %v2445_v28  ;;  %v2373_v37 = vld [vmem:[#allocation7 + $0x40] sm:$0xf] }
  0x16   :  { %v2573_v33 = vld [vmem:[#allocation7 + $0x1d0] sm:$0xf]  ;;  %v3430_v34 = vld [vmem:[#allocation7 + $0x1d4] sm:$0xf0]  ;;  %1067 = vmatpush.bf16.msra.mxu1 %v2454_v19  ;;  %v2510_v36 = vor.u32 %v3414_v32, %v2509_v30  ;;  %v3380_v38 = vld [vmem:[#allocation7 + $0x44] sm:$0xf0] }
  0x17   :  { %1081 = vmatpush.bf16.msra.mxu2 %v2518_v23  ;;  %v2437_v39 = vld [vmem:[#allocation7 + $0xc0] sm:$0xf]  ;;  %v2574_v40 = vor.u32 %v3430_v34, %v2573_v33  ;;  %v3396_v41 = vld [vmem:[#allocation7 + $0xc4] sm:$0xf0]  ;;  %v2374_v46 = vor.u32 %v3380_v38, %v2373_v37  ;;  %v2365_v49 = vld [vmem:[#allocation7 + $0x30] sm:$0xf] }
  0x18   :  { %1095 = vmatpush.bf16.msra.mxu3 %v2582_v27  ;;  %v2501_v42 = vld [vmem:[#allocation7 + $0x140] sm:$0xf]  ;;  %v3412_v43 = vld [vmem:[#allocation7 + $0x144] sm:$0xf0]  ;;  %v2438_v47 = vor.u32 %v3396_v41, %v2437_v39  ;;  %v3378_v50 = vld [vmem:[#allocation7 + $0x34] sm:$0xf0] }
  0x19   :  { %v2565_v44 = vld [vmem:[#allocation7 + $0x1c0] sm:$0xf]  ;;  %v3428_v45 = vld [vmem:[#allocation7 + $0x1c4] sm:$0xf0]  ;;  %1054 = vmatpush.bf16.msra.mxu0 %v2382_v31  ;;  %v2502_v48 = vor.u32 %v3412_v43, %v2501_v42  ;;  %v2429_v51 = vld [vmem:[#allocation7 + $0xb0] sm:$0xf]  ;;  %v2366_v58 = vor.u32 %v3378_v50, %v2365_v49  ;;  %v3645_v42 = vpack.c.bf16 %v3774_v1, %v3774_v1 }
  0x1a   :  { %1068 = vmatpush.bf16.msra.mxu1 %v2446_v35  ;;  %v2566_v52 = vor.u32 %v3428_v45, %v2565_v44  ;;  %v3394_v53 = vld [vmem:[#allocation7 + $0xb4] sm:$0xf0]  ;;  %v2493_v54 = vld [vmem:[#allocation7 + $0x130] sm:$0xf]  ;;  %v2357_v61 = vld [vmem:[#allocation7 + $0x20] sm:$0xf] }
  0x1b   :  { %1082 = vmatpush.bf16.msra.mxu2 %v2510_v36  ;;  %v3410_v55 = vld [vmem:[#allocation7 + $0x134] sm:$0xf0]  ;;  %v2557_v56 = vld [vmem:[#allocation7 + $0x1b0] sm:$0xf]  ;;  %v2430_v59 = vor.u32 %v3394_v53, %v2429_v51  ;;  %v3376_v62 = vld [vmem:[#allocation7 + $0x24] sm:$0xf0] }
  0x1c   :  { %1096 = vmatpush.bf16.msra.mxu3 %v2574_v40  ;;  %v3426_v57 = vld [vmem:[#allocation7 + $0x1b4] sm:$0xf0]  ;;  %v2494_v60 = vor.u32 %v3410_v55, %v2493_v54  ;;  %v2421_v63 = vld [vmem:[#allocation7 + $0xa0] sm:$0xf]  ;;  %v3392_v2 = vld [vmem:[#allocation7 + $0xa4] sm:$0xf0]  ;;  %v2358_v7 = vor.u32 %v3376_v62, %v2357_v61 }
  0x1d   :  { %1055 = vmatpush.bf16.msra.mxu0 %v2374_v46  ;;  %v2558_v0 = vor.u32 %v3426_v57, %v2557_v56  ;;  %v2485_v3 = vld [vmem:[#allocation7 + $0x120] sm:$0xf]  ;;  %v3408_v4 = vld [vmem:[#allocation7 + $0x124] sm:$0xf0]  ;;  %v2422_v8 = vor.u32 %v3392_v2, %v2421_v63  ;;  %v2349_v10 = vld [vmem:[#allocation7 + $0x10] sm:$0xf] }
  0x1e   :  { %1069 = vmatpush.bf16.msra.mxu1 %v2438_v47  ;;  %v2549_v5 = vld [vmem:[#allocation7 + $0x1a0] sm:$0xf]  ;;  %v3424_v6 = vld [vmem:[#allocation7 + $0x1a4] sm:$0xf0]  ;;  %v2486_v9 = vor.u32 %v3408_v4, %v2485_v3  ;;  %v3374_v11 = vld [vmem:[#allocation7 + $0x14] sm:$0xf0] }
  0x1f   :  { %1083 = vmatpush.bf16.msra.mxu2 %v2502_v48  ;;  %v2413_v12 = vld [vmem:[#allocation7 + $0x90] sm:$0xf]  ;;  %v2550_v13 = vor.u32 %v3424_v6, %v2549_v5  ;;  %v3390_v14 = vld [vmem:[#allocation7 + $0x94] sm:$0xf0]  ;;  %v2350_v19 = vor.u32 %v3374_v11, %v2349_v10  ;;  %v2341_v20 = vld [vmem:[#allocation7] sm:$0xf] }
  0x20   :  { %1097 = vmatpush.bf16.msra.mxu3 %v2566_v52  ;;  %v2477_v15 = vld [vmem:[#allocation7 + $0x110] sm:$0xf]  ;;  %v3406_v16 = vld [vmem:[#allocation7 + $0x114] sm:$0xf0]  ;;  %v3372_v21 = vld [vmem:[#allocation7 + $0x4] sm:$0xf0]  ;;  %v2414_v22 = vor.u32 %v3390_v14, %v2413_v12 }
  0x21   :  { %1056 = vmatpush.bf16.msra.mxu0 %v2366_v58  ;;  %v2541_v17 = vld [vmem:[#allocation7 + $0x190] sm:$0xf]  ;;  %v3422_v18 = vld [vmem:[#allocation7 + $0x194] sm:$0xf0]  ;;  %v2478_v23 = vor.u32 %v3406_v16, %v2477_v15  ;;  %v2405_v24 = vld [vmem:[#allocation7 + $0x80] sm:$0xf]  ;;  %v2342_v34 = vor.u32 %v3372_v21, %v2341_v20 }
  0x22   :  { %1070 = vmatpush.bf16.msra.mxu1 %v2430_v59  ;;  %v3388_v25 = vld [vmem:[#allocation7 + $0x84] sm:$0xf0]  ;;  %v2469_v26 = vld [vmem:[#allocation7 + $0x100] sm:$0xf]  ;;  %v2542_v27 = vor.u32 %v3422_v18, %v2541_v17  ;;  %v2653_v31 = vld [vmem:[#allocation7 + $0x270] sm:$0xf] }
  0x23   :  { %1084 = vmatpush.bf16.msra.mxu2 %v2494_v60  ;;  %v3404_v28 = vld [vmem:[#allocation7 + $0x104] sm:$0xf0]  ;;  %v2533_v29 = vld [vmem:[#allocation7 + $0x180] sm:$0xf]  ;;  %v3450_v32 = vld [vmem:[#allocation7 + $0x274] sm:$0xf0]  ;;  %v2406_v38 = vor.u32 %v3388_v25, %v2405_v24 }
  0x24   :  { %1098 = vmatpush.bf16.msra.mxu3 %v2558_v0  ;;  %v3420_v30 = vld [vmem:[#allocation7 + $0x184] sm:$0xf0]  ;;  %v2717_v33 = vld [vmem:[#allocation7 + $0x2f0] sm:$0xf]  ;;  %v3466_v35 = vld [vmem:[#allocation7 + $0x2f4] sm:$0xf0]  ;;  %v2470_v39 = vor.u32 %v3404_v28, %v2469_v26  ;;  %v2654_v44 = vor.u32 %v3450_v32, %v2653_v31 }
  0x25   :  { %1057 = vmatpush.bf16.msra.mxu0 %v2358_v7  ;;  %v2781_v36 = vld [vmem:[#allocation7 + $0x370] sm:$0xf]  ;;  %v3482_v37 = vld [vmem:[#allocation7 + $0x374] sm:$0xf0]  ;;  %v2534_v43 = vor.u32 %v3420_v30, %v2533_v29  ;;  %v2645_v45 = vld [vmem:[#allocation7 + $0x260] sm:$0xf]  ;;  %v2718_v46 = vor.u32 %v3466_v35, %v2717_v33 }
  0x26   :  { %1071 = vmatpush.bf16.msra.mxu1 %v2422_v8  ;;  %v2845_v40 = vld [vmem:[#allocation7 + $0x3f0] sm:$0xf]  ;;  %v3498_v41 = vld [vmem:[#allocation7 + $0x3f4] sm:$0xf0]  ;;  %v2782_v47 = vor.u32 %v3482_v37, %v2781_v36  ;;  %v3448_v48 = vld [vmem:[#allocation7 + $0x264] sm:$0xf0] }
  0x27   :  { %1085 = vmatpush.bf16.msra.mxu2 %v2486_v9  ;;  %v2709_v49 = vld [vmem:[#allocation7 + $0x2e0] sm:$0xf]  ;;  %v3464_v50 = vld [vmem:[#allocation7 + $0x2e4] sm:$0xf0]  ;;  %v2846_v51 = vor.u32 %v3498_v41, %v2845_v40  ;;  %v2637_v56 = vld [vmem:[#allocation7 + $0x250] sm:$0xf]  ;;  %v2646_v57 = vor.u32 %v3448_v48, %v2645_v45 }
  0x28   :  { %1099 = vmatpush.bf16.msra.mxu3 %v2550_v13  ;;  %v2773_v52 = vld [vmem:[#allocation7 + $0x360] sm:$0xf]  ;;  %v3480_v53 = vld [vmem:[#allocation7 + $0x364] sm:$0xf0]  ;;  %3646 = vst [vmem:[#allocation11 + $0x20] sm:$0xff] %v3645_v42   ;;  %v2710_v61 = vor.u32 %v3464_v50, %v2709_v49 }
  0x29   :  { %1058 = vmatpush.bf16.msra.mxu0 %v2350_v19  ;;  %v2837_v54 = vld [vmem:[#allocation7 + $0x3e0] sm:$0xf]  ;;  %v3496_v55 = vld [vmem:[#allocation7 + $0x3e4] sm:$0xf0]  ;;  %v3446_v58 = vld [vmem:[#allocation7 + $0x254] sm:$0xf0]  ;;  %v2774_v62 = vor.u32 %v3480_v53, %v2773_v52 }
  0x2a   :  { %1072 = vmatpush.bf16.msra.mxu1 %v2414_v22  ;;  %v63_v1 = vld [vmem:[%s3910_s2] sm:$0xff]   ;;  %v2701_v59 = vld [vmem:[#allocation7 + $0x2d0] sm:$0xf]  ;;  %v3674_v60 = vld [vmem:[%s3910_s2 + $0x8] sm:$0xff]  ;;  %3651 = vst [vmem:[#allocation11 + $0x28] sm:$0xff] %v3645_v42   ;;  %v2838_v2 = vor.u32 %v3496_v55, %v2837_v54  ;;  %v2638_v7 = vor.u32 %v3446_v58, %v2637_v56 }
  0x2b   :  { %1086 = vmatpush.bf16.msra.mxu2 %v2478_v23  ;;  %69 = vst [vmem:[#allocation11] sm:$0xff] %v63_v1   ;;  %v3462_v63 = vld [vmem:[#allocation7 + $0x2d4] sm:$0xf0]  ;;  %v2765_v0 = vld [vmem:[#allocation7 + $0x350] sm:$0xf] }
  0x2c   :  { %1100 = vmatpush.bf16.msra.mxu3 %v2542_v27  ;;  %v3478_v3 = vld [vmem:[#allocation7 + $0x354] sm:$0xf0]  ;;  %v2829_v4 = vld [vmem:[#allocation7 + $0x3d0] sm:$0xf]  ;;  %3656 = vst [vmem:[#allocation11 + $0x30] sm:$0xff] %v3645_v42   ;;  %v2702_v10 = vor.u32 %v3462_v63, %v2701_v59 }
  0x2d   :  { %1059 = vmatpush.bf16.msra.mxu0 %v2342_v34  ;;  %v3494_v5 = vld [vmem:[#allocation7 + $0x3d4] sm:$0xf0]  ;;  %v2629_v6 = vld [vmem:[#allocation7 + $0x240] sm:$0xf]  ;;  %3661 = vst [vmem:[#allocation11 + $0x38] sm:$0xff] %v3645_v42   ;;  %v2766_v11 = vor.u32 %v3478_v3, %v2765_v0 }
  0x2e   :  { %1073 = vmatpush.bf16.msra.mxu1 %v2406_v38  ;;  %v3444_v8 = vld [vmem:[#allocation7 + $0x244] sm:$0xf0]  ;;  %v2693_v9 = vld [vmem:[#allocation7 + $0x2c0] sm:$0xf]  ;;  %3631 = vst [vmem:[#allocation11 + $0x8] sm:$0xff] %v3674_v60   ;;  %v2830_v15 = vor.u32 %v3494_v5, %v2829_v4 }
  0x2f   :  { %1087 = vmatpush.bf16.msra.mxu2 %v2470_v39  ;;  %v3460_v12 = vld [vmem:[#allocation7 + $0x2c4] sm:$0xf0]  ;;  %v2757_v13 = vld [vmem:[#allocation7 + $0x340] sm:$0xf]  ;;  %v2311_v18 = vld [vmem:[#allocation11 + $0x20] sm:$0xf0]  ;;  %v2630_v22 = vor.u32 %v3444_v8, %v2629_v6 }
  0x30   :  { %1101 = vmatpush.bf16.msra.mxu3 %v2534_v43  ;;  %v3476_v14 = vld [vmem:[#allocation7 + $0x344] sm:$0xf0]  ;;  %v2821_v16 = vld [vmem:[#allocation7 + $0x3c0] sm:$0xf]  ;;  %v2621_v24 = vld [vmem:[#allocation7 + $0x230] sm:$0xf]  ;;  %v2694_v28 = vor.u32 %v3460_v12, %v2693_v9 }
  0x31   :  { %1108 = vmatpush.bf16.msrb.mxu0 %v2654_v44  ;;  %v3367_v17 = vld [vmem:[#allocation11 + $0x1c] sm:$0xf0]  ;;  %v3492_v19 = vld [vmem:[#allocation7 + $0x3c4] sm:$0xf0]  ;;  %v3442_v25 = vld [vmem:[#allocation7 + $0x234] sm:$0xf0]  ;;  %v2758_v29 = vor.u32 %v3476_v14, %v2757_v13 }
  0x32   :  { %1122 = vmatpush.bf16.msrb.mxu1 %v2718_v46  ;;  %v2309_v20 = vld [vmem:[#allocation11] sm:$0xf]  ;;  %v3363_v21 = vld [vmem:[#allocation11 + $0x4] sm:$0xf]  ;;  %v2685_v26 = vld [vmem:[#allocation7 + $0x2b0] sm:$0xf]  ;;  %v2822_v33 = vor.u32 %v3492_v19, %v2821_v16  ;;  %v2622_v41 = vor.u32 %v3442_v25, %v2621_v24 }
  0x33   :  { %1136 = vmatpush.bf16.msrb.mxu2 %v2782_v47  ;;  %v3790_v23 = vor.u32 %v3367_v17, %v2309_v20  ;;  %v3792_v27 = vor.u32 %v3363_v21, %v2311_v18  ;;  %v3368_v30 = vld [vmem:[#allocation11 + $0x24] sm:$0xf0]  ;;  %v3458_v31 = vld [vmem:[#allocation7 + $0x2b4] sm:$0xf0]  ;;  %v2319_v32 = vld [vmem:[#allocation11 + $0x28] sm:$0xf0] }
  0x34   :  { %1150 = vmatpush.bf16.msrb.mxu3 %v2846_v51  ;;  %v2749_v34 = vld [vmem:[#allocation7 + $0x330] sm:$0xf]  ;;  %v3474_v35 = vld [vmem:[#allocation7 + $0x334] sm:$0xf0]  ;;  %v2686_v45 = vor.u32 %v3458_v31, %v2685_v26  ;;  %v2613_v47 = vld [vmem:[#allocation7 + $0x220] sm:$0xf] }
  0x35   :  { %1109 = vmatpush.bf16.msrb.mxu0 %v2646_v57  ;;  %v2813_v36 = vld [vmem:[#allocation7 + $0x3b0] sm:$0xf]  ;;  %v2317_v37 = vld [vmem:[#allocation11 + $0x8] sm:$0xf]  ;;  %v3490_v38 = vld [vmem:[#allocation7 + $0x3b4] sm:$0xf0]  ;;  %1074 = vmatmul.bf16.vlgmr.msra.gmra.mxu1 %v3792_v27  ;;  %v2750_v46 = vor.u32 %v3474_v35, %v2749_v34 }
  0x36   :  { %1123 = vmatpush.bf16.msrb.mxu1 %v2710_v61  ;;  %1060 = vmatmul.bf16.vlgmr.msra.gmra.mxu0 %v3790_v23  ;;  %v3364_v39 = vld [vmem:[#allocation11 + $0xc] sm:$0xf]  ;;  %v3796_v40 = vor.u32 %v3368_v30, %v2317_v37  ;;  %v3675_v43 = vld [vmem:[%s3910_s2 + $0x10] sm:$0xff]  ;;  %v3676_v44 = vld [vmem:[%s3910_s2 + $0x18] sm:$0xff]  ;;  %v2814_v50 = vor.u32 %v3490_v38, %v2813_v36 }
  0x37   :  { %1137 = vmatpush.bf16.msrb.mxu2 %v2774_v62  ;;  %v3798_v42 = vor.u32 %v3364_v39, %v2319_v32  ;;  %v3440_v48 = vld [vmem:[#allocation7 + $0x224] sm:$0xf0]  ;;  %v2677_v49 = vld [vmem:[#allocation7 + $0x2a0] sm:$0xf]  ;;  %v2605_v1 = vld [vmem:[#allocation7 + $0x210] sm:$0xf] }
  0x38   :  { %1151 = vmatpush.bf16.msrb.mxu3 %v2838_v2  ;;  %1088 = vmatmul.bf16.vlgmr.msra.gmra.mxu2 %v3796_v40  ;;  %v3456_v51 = vld [vmem:[#allocation7 + $0x2a4] sm:$0xf0]  ;;  %v2741_v52 = vld [vmem:[#allocation7 + $0x320] sm:$0xf]  ;;  %v2614_v56 = vor.u32 %v3440_v48, %v2613_v47  ;;  %v3438_v57 = vld [vmem:[#allocation7 + $0x214] sm:$0xf0] }
  0x39   :  { %1110 = vmatpush.bf16.msrb.mxu0 %v2638_v7  ;;  %v3472_v53 = vld [vmem:[#allocation7 + $0x324] sm:$0xf0]  ;;  %1102 = vmatmul.bf16.vlgmr.msra.gmra.mxu3 %v3798_v42  ;;  %v2805_v54 = vld [vmem:[#allocation7 + $0x3a0] sm:$0xf]  ;;  %v2669_v58 = vld [vmem:[#allocation7 + $0x290] sm:$0xf]  ;;  %v2678_v59 = vor.u32 %v3456_v51, %v2677_v49  ;;  %v2606_v6 = vor.u32 %v3438_v57, %v2605_v1 }
  0x3a   :  { %1124 = vmatpush.bf16.msrb.mxu1 %v2702_v10  ;;  %v3488_v55 = vld [vmem:[#allocation7 + $0x3a4] sm:$0xf0]  ;;  %v2742_v60 = vor.u32 %v3472_v53, %v2741_v52  ;;  %v3454_v61 = vld [vmem:[#allocation7 + $0x294] sm:$0xf0]  ;;  %v2733_v62 = vld [vmem:[#allocation7 + $0x310] sm:$0xf] }
  0x3b   :  { %1138 = vmatpush.bf16.msrb.mxu2 %v2766_v11  ;;  %3636 = vst [vmem:[#allocation11 + $0x10] sm:$0xff] %v3675_v43   ;;  %v2806_v63 = vor.u32 %v3488_v55, %v2805_v54  ;;  %v3470_v0 = vld [vmem:[#allocation7 + $0x314] sm:$0xf0]  ;;  %v2797_v2 = vld [vmem:[#allocation7 + $0x390] sm:$0xf]  ;;  %v2670_v11 = vor.u32 %v3454_v61, %v2669_v58 }
  0x3c   :  { %1152 = vmatpush.bf16.msrb.mxu3 %v2830_v15  ;;  %3641 = vst [vmem:[#allocation11 + $0x18] sm:$0xff] %v3676_v44   ;;  %v3486_v3 = vld [vmem:[#allocation7 + $0x394] sm:$0xf0]  ;;  %v2597_v4 = vld [vmem:[#allocation7 + $0x200] sm:$0xf]  ;;  %v2734_v12 = vor.u32 %v3470_v0, %v2733_v62 }
  0x3d   :  { %1111 = vmatpush.bf16.msrb.mxu0 %v2630_v22  ;;  %v3436_v5 = vld [vmem:[#allocation7 + $0x204] sm:$0xf0]  ;;  %v2661_v7 = vld [vmem:[#allocation7 + $0x280] sm:$0xf]  ;;  %v3385_v15 = vld [vmem:[#allocation7 + $0x74] sm:$0xf]  ;;  %v2798_v16 = vor.u32 %v3486_v3, %v2797_v2 }
  0x3e   :  { %1125 = vmatpush.bf16.msrb.mxu1 %v2694_v28  ;;  %v3452_v8 = vld [vmem:[#allocation7 + $0x284] sm:$0xf0]  ;;  %v2725_v9 = vld [vmem:[#allocation7 + $0x300] sm:$0xf]  ;;  %v2399_v17 = vld [vmem:[#allocation7 + $0x78] sm:$0xf0]  ;;  %v2598_v24 = vor.u32 %v3436_v5, %v2597_v4 }
  0x3f   :  { %1139 = vmatpush.bf16.msrb.mxu2 %v2758_v29  ;;  %v3468_v10 = vld [vmem:[#allocation7 + $0x304] sm:$0xf0]  ;;  %v2789_v13 = vld [vmem:[#allocation7 + $0x380] sm:$0xf]  ;;  %v3401_v18 = vld [vmem:[#allocation7 + $0xf4] sm:$0xf]  ;;  %v2662_v29 = vor.u32 %v3452_v8, %v2661_v7  ;;  %v2402_v35 = vor.u32 %v3385_v15, %v2399_v17 }
  0x40   :  { %1153 = vmatpush.bf16.msrb.mxu3 %v2822_v33  ;;  %v3484_v14 = vld [vmem:[#allocation7 + $0x384] sm:$0xf0]  ;;  %v2463_v19 = vld [vmem:[#allocation7 + $0xf8] sm:$0xf0]  ;;  %v3417_v20 = vld [vmem:[#allocation7 + $0x174] sm:$0xf]  ;;  %v2726_v30 = vor.u32 %v3468_v10, %v2725_v9 }
  0x41   :  { %1112 = vmatpush.bf16.msrb.mxu0 %v2622_v41  ;;  %v2527_v21 = vld [vmem:[#allocation7 + $0x178] sm:$0xf0]  ;;  %v3433_v22 = vld [vmem:[#allocation7 + $0x1f4] sm:$0xf]  ;;  %v3369_v26 = vld [vmem:[#allocation11 + $0x2c] sm:$0xf0]  ;;  %v2790_v34 = vor.u32 %v3484_v14, %v2789_v13  ;;  %v2466_v39 = vor.u32 %v3401_v18, %v2463_v19 }
  0x42   :  { %1126 = vmatpush.bf16.msrb.mxu1 %v2686_v45  ;;  %v2591_v25 = vld [vmem:[#allocation7 + $0x1f8] sm:$0xf0]  ;;  %v3370_v28 = vld [vmem:[#allocation11 + $0x34] sm:$0xf0]  ;;  %v2325_v31 = vld [vmem:[#allocation11 + $0x10] sm:$0xf]  ;;  %v2530_v41 = vor.u32 %v3417_v20, %v2527_v21 }
  0x43   :  { %1140 = vmatpush.bf16.msrb.mxu2 %v2750_v46  ;;  %v2327_v32 = vld [vmem:[#allocation11 + $0x30] sm:$0xf0]  ;;  %v2335_v33 = vld [vmem:[#allocation11 + $0x38] sm:$0xf0]  ;;  %v2333_v36 = vld [vmem:[#allocation11 + $0x18] sm:$0xf]  ;;  %v2594_v46 = vor.u32 %v3433_v22, %v2591_v25  ;;  %v3808_v47 = vor.u32 %v3369_v26, %v2325_v31 }
  0x44   :  { %1154 = vmatpush.bf16.msrb.mxu3 %v2814_v50  ;;  %v3365_v37 = vld [vmem:[#allocation11 + $0x14] sm:$0xf]  ;;  %v3383_v38 = vld [vmem:[#allocation7 + $0x64] sm:$0xf]  ;;  %v3366_v43 = vld [vmem:[#allocation11 + $0x1c] sm:$0xf]  ;;  %v3810_v51 = vor.u32 %v3370_v28, %v2333_v36 }
  0x45   :  { %1113 = vmatpush.bf16.msrb.mxu0 %v2614_v56  ;;  %v2391_v44 = vld [vmem:[#allocation7 + $0x68] sm:$0xf0]  ;;  %v3399_v45 = vld [vmem:[#allocation7 + $0xe4] sm:$0xf]  ;;  %v3812_v52 = vor.u32 %v3365_v37, %v2327_v32  ;;  %v3814_v55 = vor.u32 %v3366_v43, %v2335_v33  ;;  %v3381_v58 = vld [vmem:[#allocation7 + $0x54] sm:$0xf] }
  0x46   :  { %1127 = vmatpush.bf16.msrb.mxu1 %v2678_v59  ;;  %v2455_v48 = vld [vmem:[#allocation7 + $0xe8] sm:$0xf0]  ;;  %v3415_v49 = vld [vmem:[#allocation7 + $0x164] sm:$0xf]  ;;  %v2394_v56 = vor.u32 %v3383_v38, %v2391_v44  ;;  %v2383_v59 = vld [vmem:[#allocation7 + $0x58] sm:$0xf0] }
  0x47   :  { %1141 = vmatpush.bf16.msrb.mxu2 %v2742_v60  ;;  %v2519_v50 = vld [vmem:[#allocation7 + $0x168] sm:$0xf0]  ;;  %v3431_v53 = vld [vmem:[#allocation7 + $0x1e4] sm:$0xf]  ;;  %v2458_v1 = vor.u32 %v3399_v45, %v2455_v48  ;;  %v3397_v60 = vld [vmem:[#allocation7 + $0xd4] sm:$0xf]  ;;  %v2386_v4 = vor.u32 %v3381_v58, %v2383_v59 }
  0x48   :  { %1155 = vmatpush.bf16.msrb.mxu3 %v2806_v63  ;;  %v2583_v54 = vld [vmem:[#allocation7 + $0x1e8] sm:$0xf0]  ;;  %v2522_v57 = vor.u32 %v3415_v49, %v2519_v50  ;;  %v2447_v62 = vld [vmem:[#allocation7 + $0xd8] sm:$0xf0]  ;;  %v3413_v63 = vld [vmem:[#allocation7 + $0x154] sm:$0xf] }
  0x49   :  { %1114 = vmatpush.bf16.msrb.mxu0 %v2606_v6  ;;  %v2586_v61 = vor.u32 %v3431_v53, %v2583_v54  ;;  %v2511_v0 = vld [vmem:[#allocation7 + $0x158] sm:$0xf0]  ;;  %v3429_v2 = vld [vmem:[#allocation7 + $0x1d4] sm:$0xf]  ;;  %v2450_v5 = vor.u32 %v3397_v60, %v2447_v62  ;;  %v3379_v7 = vld [vmem:[#allocation7 + $0x44] sm:$0xf] }
  0x4a   :  { %1128 = vmatpush.bf16.msrb.mxu1 %v2670_v11  ;;  %v2575_v3 = vld [vmem:[#allocation7 + $0x1d8] sm:$0xf0]  ;;  %v2514_v6 = vor.u32 %v3413_v63, %v2511_v0  ;;  %v2375_v8 = vld [vmem:[#allocation7 + $0x48] sm:$0xf0]  ;;  %v3395_v9 = vld [vmem:[#allocation7 + $0xc4] sm:$0xf] }
  0x4b   :  { %1142 = vmatpush.bf16.msrb.mxu2 %v2734_v12  ;;  %v2578_v10 = vor.u32 %v3429_v2, %v2575_v3  ;;  %v2439_v11 = vld [vmem:[#allocation7 + $0xc8] sm:$0xf0]  ;;  %v3411_v12 = vld [vmem:[#allocation7 + $0x144] sm:$0xf]  ;;  %v3377_v19 = vld [vmem:[#allocation7 + $0x34] sm:$0xf] }
  0x4c   :  { %1156 = vmatpush.bf16.msrb.mxu3 %v2798_v16  ;;  %v2503_v13 = vld [vmem:[#allocation7 + $0x148] sm:$0xf0]  ;;  %v3427_v14 = vld [vmem:[#allocation7 + $0x1c4] sm:$0xf]  ;;  %v2378_v16 = vor.u32 %v3379_v7, %v2375_v8  ;;  %v2442_v17 = vor.u32 %v3395_v9, %v2439_v11  ;;  %v2367_v20 = vld [vmem:[#allocation7 + $0x38] sm:$0xf0] }
  0x4d   :  { %1115 = vmatpush.bf16.msrb.mxu0 %v2598_v24  ;;  %v2567_v15 = vld [vmem:[#allocation7 + $0x1c8] sm:$0xf0]  ;;  %v2506_v18 = vor.u32 %v3411_v12, %v2503_v13  ;;  %v3393_v21 = vld [vmem:[#allocation7 + $0xb4] sm:$0xf]  ;;  %v2431_v24 = vld [vmem:[#allocation7 + $0xb8] sm:$0xf0] }
  0x4e   :  { %1129 = vmatpush.bf16.msrb.mxu1 %v2662_v29  ;;  %v2570_v22 = vor.u32 %v3427_v14, %v2567_v15  ;;  %v3409_v25 = vld [vmem:[#allocation7 + $0x134] sm:$0xf]  ;;  %v2495_v26 = vld [vmem:[#allocation7 + $0x138] sm:$0xf0]  ;;  %v2434_v31 = vor.u32 %v3393_v21, %v2431_v24  ;;  %v3375_v33 = vld [vmem:[#allocation7 + $0x24] sm:$0xf] }
  0x4f   :  { %1143 = vmatpush.bf16.msrb.mxu2 %v2726_v30  ;;  %v3425_v28 = vld [vmem:[#allocation7 + $0x1b4] sm:$0xf]  ;;  %v2559_v29 = vld [vmem:[#allocation7 + $0x1b8] sm:$0xf0]  ;;  %v2370_v30 = vor.u32 %v3377_v19, %v2367_v20  ;;  %v2498_v32 = vor.u32 %v3409_v25, %v2495_v26  ;;  %v2423_v37 = vld [vmem:[#allocation7 + $0xa8] sm:$0xf0] }
  0x50   :  { %1157 = vmatpush.bf16.msrb.mxu3 %v2790_v34  ;;  %1116 = vmatmul.bf16.vlgmr.msrb.gmra.mxu0 %v3808_v47  ;;  %v2359_v34 = vld [vmem:[#allocation7 + $0x28] sm:$0xf0]  ;;  %v2562_v36 = vor.u32 %v3425_v28, %v2559_v29  ;;  %v3407_v38 = vld [vmem:[#allocation7 + $0x124] sm:$0xf]  ;;  %v3373_v48 = vld [vmem:[#allocation7 + $0x14] sm:$0xf] }
  0x51   :  { %1164 = vmatpush.bf16.msra.mxu0 %v2402_v35  ;;  %1130 = vmatmul.bf16.vlgmr.msrb.gmra.mxu1 %v3812_v52  ;;  %v3391_v35 = vld [vmem:[#allocation7 + $0xa4] sm:$0xf]  ;;  %v2551_v43 = vld [vmem:[#allocation7 + $0x1a8] sm:$0xf0]  ;;  %v2362_v44 = vor.u32 %v3375_v33, %v2359_v34  ;;  %v2351_v49 = vld [vmem:[#allocation7 + $0x18] sm:$0xf0] }
  0x52   :  { %1178 = vmatpush.bf16.msra.mxu1 %v2466_v39  ;;  %1144 = vmatmul.bf16.vlgmr.msrb.gmra.mxu2 %v3810_v51  ;;  %v2487_v39 = vld [vmem:[#allocation7 + $0x128] sm:$0xf0]  ;;  %v2426_v45 = vor.u32 %v3391_v35, %v2423_v37  ;;  %v3389_v50 = vld [vmem:[#allocation7 + $0x94] sm:$0xf]  ;;  %v2415_v54 = vld [vmem:[#allocation7 + $0x98] sm:$0xf0]  ;;  %v2354_v59 = vor.u32 %v3373_v48, %v2351_v49 }
  0x53   :  { %1192 = vmatpush.bf16.msra.mxu2 %v2530_v41  ;;  %1158 = vmatmul.bf16.vlgmr.msrb.gmra.mxu3 %v3814_v55  ;;  %v3423_v41 = vld [vmem:[#allocation7 + $0x1a4] sm:$0xf]  ;;  %v2543_v58 = vld [vmem:[#allocation7 + $0x198] sm:$0xf0]  ;;  %v2418_v62 = vor.u32 %v3389_v50, %v2415_v54  ;;  %v2407_v2 = vld [vmem:[#allocation7 + $0x88] sm:$0xf0] }
  0x54   :  { %1206 = vmatpush.bf16.msra.mxu3 %v2594_v46  ;;  %v2490_v46 = vor.u32 %v3407_v38, %v2487_v39  ;;  %v2554_v53 = vor.u32 %v3423_v41, %v2551_v43  ;;  %v3371_v60 = vld [vmem:[#allocation7 + $0x4] sm:$0xf]  ;;  %v2535_v7 = vld [vmem:[#allocation7 + $0x188] sm:$0xf0]  ;;  %v3449_v8 = vld [vmem:[#allocation7 + $0x274] sm:$0xf] }
  0x55   :  { %1165 = vmatpush.bf16.msra.mxu0 %v2394_v56  ;;  %v3405_v56 = vld [vmem:[#allocation7 + $0x114] sm:$0xf]  ;;  %v3387_v0 = vld [vmem:[#allocation7 + $0x84] sm:$0xf]  ;;  %v2655_v9 = vld [vmem:[#allocation7 + $0x278] sm:$0xf0] }
  0x56   :  { %1179 = vmatpush.bf16.msra.mxu1 %v2458_v1  ;;  %v2479_v1 = vld [vmem:[#allocation7 + $0x118] sm:$0xf0]  ;;  %v3403_v3 = vld [vmem:[#allocation7 + $0x104] sm:$0xf]  ;;  %v3481_v13 = vld [vmem:[#allocation7 + $0x374] sm:$0xf]  ;;  %v2410_v15 = vor.u32 %v3387_v0, %v2407_v2  ;;  %v2658_v20 = vor.u32 %v3449_v8, %v2655_v9 }
  0x57   :  { %1193 = vmatpush.bf16.msra.mxu2 %v2522_v57  ;;  %v3421_v57 = vld [vmem:[#allocation7 + $0x194] sm:$0xf]  ;;  %v2482_v63 = vor.u32 %v3405_v56, %v2479_v1  ;;  %v2719_v12 = vld [vmem:[#allocation7 + $0x2f8] sm:$0xf0]  ;;  %v3447_v24 = vld [vmem:[#allocation7 + $0x264] sm:$0xf] }
  0x58   :  { %1207 = vmatpush.bf16.msra.mxu3 %v2586_v61  ;;  %v2343_v61 = vld [vmem:[#allocation7 + $0x8] sm:$0xf0]  ;;  %v2783_v14 = vld [vmem:[#allocation7 + $0x378] sm:$0xf0]  ;;  %v3463_v26 = vld [vmem:[#allocation7 + $0x2e4] sm:$0xf] }
  0x59   :  { %1166 = vmatpush.bf16.msra.mxu0 %v2386_v4  ;;  %v2546_v4 = vor.u32 %v3421_v57, %v2543_v58  ;;  %v2346_v11 = vor.u32 %v3371_v60, %v2343_v61  ;;  %v2647_v25 = vld [vmem:[#allocation7 + $0x268] sm:$0xf0]  ;;  %v3445_v37 = vld [vmem:[#allocation7 + $0x254] sm:$0xf]  ;;  %v2639_v38 = vld [vmem:[#allocation7 + $0x258] sm:$0xf0] }
  0x5a   :  { %1180 = vmatpush.bf16.msra.mxu1 %v2450_v5  ;;  %v2471_v5 = vld [vmem:[#allocation7 + $0x108] sm:$0xf0]  ;;  %v2650_v34 = vor.u32 %v3447_v24, %v2647_v25  ;;  %v3461_v39 = vld [vmem:[#allocation7 + $0x2d4] sm:$0xf]  ;;  %v2703_v43 = vld [vmem:[#allocation7 + $0x2d8] sm:$0xf0]  ;;  %v2642_v49 = vor.u32 %v3445_v37, %v2639_v38 }
  0x5b   :  { %1194 = vmatpush.bf16.msra.mxu2 %v2514_v6  ;;  %v3419_v6 = vld [vmem:[#allocation7 + $0x184] sm:$0xf]  ;;  %v2711_v29 = vld [vmem:[#allocation7 + $0x2e8] sm:$0xf0]  ;;  %v2831_v48 = vld [vmem:[#allocation7 + $0x3d8] sm:$0xf0]  ;;  %v2706_v50 = vor.u32 %v3461_v39, %v2703_v43 }
  0x5c   :  { %1208 = vmatpush.bf16.msra.mxu3 %v2578_v10  ;;  %v3465_v10 = vld [vmem:[#allocation7 + $0x2f4] sm:$0xf]  ;;  %v2538_v19 = vor.u32 %v3419_v6, %v2535_v7  ;;  %v2839_v33 = vld [vmem:[#allocation7 + $0x3e8] sm:$0xf0]  ;;  %v2714_v35 = vor.u32 %v3463_v26, %v2711_v29  ;;  %v3443_v54 = vld [vmem:[#allocation7 + $0x244] sm:$0xf] }
  0x5d   :  { %1167 = vmatpush.bf16.msra.mxu0 %v2378_v16  ;;  %v2474_v16 = vor.u32 %v3403_v3, %v2471_v5  ;;  %v2722_v21 = vor.u32 %v3465_v10, %v2719_v12  ;;  %v2631_v56 = vld [vmem:[#allocation7 + $0x248] sm:$0xf0]  ;;  %v3475_v58 = vld [vmem:[#allocation7 + $0x344] sm:$0xf]  ;;  %v3457_v0 = vld [vmem:[#allocation7 + $0x2b4] sm:$0xf] }
  0x5e   :  { %1181 = vmatpush.bf16.msra.mxu1 %v2442_v17  ;;  %v3497_v17 = vld [vmem:[#allocation7 + $0x3f4] sm:$0xf]  ;;  %v2695_v57 = vld [vmem:[#allocation7 + $0x2c8] sm:$0xf0]  ;;  %v2687_v3 = vld [vmem:[#allocation7 + $0x2b8] sm:$0xf0] }
  0x5f   :  { %1195 = vmatpush.bf16.msra.mxu2 %v2506_v18  ;;  %v2847_v18 = vld [vmem:[#allocation7 + $0x3f8] sm:$0xf0]  ;;  %v2823_v60 = vld [vmem:[#allocation7 + $0x3c8] sm:$0xf0]  ;;  %v3489_v6 = vld [vmem:[#allocation7 + $0x3b4] sm:$0xf]  ;;  %v2690_v9 = vor.u32 %v3457_v0, %v2687_v3 }
  0x60   :  { %1209 = vmatpush.bf16.msra.mxu3 %v2570_v22  ;;  %v2786_v22 = vor.u32 %v3481_v13, %v2783_v14  ;;  %v2850_v28 = vor.u32 %v3497_v17, %v2847_v18  ;;  %v2751_v5 = vld [vmem:[#allocation7 + $0x338] sm:$0xf0]  ;;  %v2615_v12 = vld [vmem:[#allocation7 + $0x228] sm:$0xf0]  ;;  %v3455_v13 = vld [vmem:[#allocation7 + $0x2a4] sm:$0xf] }
  0x61   :  { %1168 = vmatpush.bf16.msra.mxu0 %v2370_v30  ;;  %v3479_v30 = vld [vmem:[#allocation7 + $0x364] sm:$0xf]  ;;  %v2815_v7 = vld [vmem:[#allocation7 + $0x3b8] sm:$0xf0]  ;;  %v2743_v17 = vld [vmem:[#allocation7 + $0x328] sm:$0xf0] }
  0x62   :  { %1182 = vmatpush.bf16.msra.mxu1 %v2434_v31  ;;  %v2775_v31 = vld [vmem:[#allocation7 + $0x368] sm:$0xf0]  ;;  %v2818_v14 = vor.u32 %v3489_v6, %v2815_v7  ;;  %v3487_v18 = vld [vmem:[#allocation7 + $0x3a4] sm:$0xf]  ;;  %v3437_v24 = vld [vmem:[#allocation7 + $0x214] sm:$0xf] }
  0x63   :  { %1196 = vmatpush.bf16.msra.mxu2 %v2498_v32  ;;  %v3495_v32 = vld [vmem:[#allocation7 + $0x3e4] sm:$0xf]  ;;  %v2607_v25 = vld [vmem:[#allocation7 + $0x218] sm:$0xf0]  ;;  %v3453_v26 = vld [vmem:[#allocation7 + $0x294] sm:$0xf] }
  0x64   :  { %1210 = vmatpush.bf16.msra.mxu3 %v2562_v36  ;;  %v2778_v36 = vor.u32 %v3479_v30, %v2775_v31  ;;  %v2842_v41 = vor.u32 %v3495_v32, %v2839_v33  ;;  %v2671_v29 = vld [vmem:[#allocation7 + $0x298] sm:$0xf0]  ;;  %v3469_v30 = vld [vmem:[#allocation7 + $0x314] sm:$0xf]  ;;  %v2599_v38 = vld [vmem:[#allocation7 + $0x208] sm:$0xf0] }
  0x65   :  { %1169 = vmatpush.bf16.msra.mxu0 %v2362_v44  ;;  %v3477_v44 = vld [vmem:[#allocation7 + $0x354] sm:$0xf]  ;;  %v2735_v31 = vld [vmem:[#allocation7 + $0x318] sm:$0xf0]  ;;  %v3451_v39 = vld [vmem:[#allocation7 + $0x284] sm:$0xf] }
  0x66   :  { %1183 = vmatpush.bf16.msra.mxu1 %v2426_v45  ;;  %v2767_v45 = vld [vmem:[#allocation7 + $0x358] sm:$0xf0]  ;;  %v3485_v32 = vld [vmem:[#allocation7 + $0x394] sm:$0xf]  ;;  %v2738_v37 = vor.u32 %v3469_v30, %v2735_v31  ;;  %v3543_v0 = vld [vmem:[#allocation9 + $0x15c] sm:$0xf0] }
  0x67   :  { %1197 = vmatpush.bf16.msra.mxu2 %v2490_v46  ;;  %v3493_v46 = vld [vmem:[#allocation7 + $0x3d4] sm:$0xf]  ;;  %v2799_v33 = vld [vmem:[#allocation7 + $0x398] sm:$0xf0]  ;;  %v3015_v3 = vld [vmem:[#allocation9 + $0x160] sm:$0xf0] }
  0x68   :  { %1211 = vmatpush.bf16.msra.mxu3 %v2554_v53  ;;  %v2770_v53 = vor.u32 %v3477_v44, %v2767_v45  ;;  %v2834_v1 = vor.u32 %v3493_v46, %v2831_v48  ;;  %v2802_v43 = vor.u32 %v3485_v32, %v2799_v33  ;;  %v3467_v44 = vld [vmem:[#allocation7 + $0x304] sm:$0xf]  ;;  %v2727_v45 = vld [vmem:[#allocation7 + $0x308] sm:$0xf0]  ;;  %v2981_v6 = vld [vmem:[#allocation9 + $0x100] sm:$0xf] }
  0x69   :  { %1170 = vmatpush.bf16.msra.mxu0 %v2354_v59  ;;  %v3491_v59 = vld [vmem:[#allocation7 + $0x3c4] sm:$0xf]  ;;  %v2791_v48 = vld [vmem:[#allocation7 + $0x388] sm:$0xf0]  ;;  %v3535_v7 = vld [vmem:[#allocation9 + $0x11c] sm:$0xf0] }
  0x6a   :  { %1184 = vmatpush.bf16.msra.mxu1 %v2418_v62  ;;  %v3441_v62 = vld [vmem:[#allocation7 + $0x234] sm:$0xf]  ;;  %v2826_v2 = vor.u32 %v3491_v59, %v2823_v60  ;;  %v3483_v46 = vld [vmem:[#allocation7 + $0x384] sm:$0xf]  ;;  %v3045_v59 = vld [vmem:[#allocation9 + $0x180] sm:$0xf] }
  0x6b   :  { %1198 = vmatpush.bf16.msra.mxu2 %v2482_v63  ;;  %v2623_v63 = vld [vmem:[#allocation7 + $0x238] sm:$0xf0]  ;;  %v3551_v60 = vld [vmem:[#allocation9 + $0x19c] sm:$0xf0]  ;;  %v3499_v30 = vld [vmem:[#allocation9 + $0x4] sm:$0xf] }
  0x6c   :  { %1212 = vmatpush.bf16.msra.mxu3 %v2546_v4  ;;  %v3473_v4 = vld [vmem:[#allocation7 + $0x334] sm:$0xf]  ;;  %v2626_v8 = vor.u32 %v3441_v62, %v2623_v63  ;;  %v3013_v63 = vld [vmem:[#allocation9 + $0x140] sm:$0xf]  ;;  %v2855_v32 = vld [vmem:[#allocation9 + $0x20] sm:$0xf0] }
  0x6d   :  { %1171 = vmatpush.bf16.msra.mxu0 %v2346_v11  ;;  %v2754_v10 = vor.u32 %v3473_v4, %v2751_v5  ;;  %v3439_v11 = vld [vmem:[#allocation7 + $0x224] sm:$0xf]  ;;  %v3014_v4 = vor.u32 %v3543_v0, %v3013_v63  ;;  %v2858_v33 = vor.u32 %v3499_v30, %v2855_v32  ;;  %v2959_v63 = vld [vmem:[#allocation9 + $0xe8] sm:$0xf0]  ;;  %v3615_v32 = vld [vmem:[#allocation9 + $0x39c] sm:$0xf0] }
  0x6e   :  { %1185 = vmatpush.bf16.msra.mxu1 %v2410_v15  ;;  %v2679_v15 = vld [vmem:[#allocation7 + $0x2a8] sm:$0xf0] }
  0x6f   :  { %1199 = vmatpush.bf16.msra.mxu2 %v2474_v16  ;;  %v3471_v16 = vld [vmem:[#allocation7 + $0x324] sm:$0xf] }
  0x70   :  { %1213 = vmatpush.bf16.msra.mxu3 %v2538_v19  ;;  %1172 = vmatmul.bf16.vlgmr.msra.gmra.mxu0 %v3790_v23  ;;  %v2634_v23 = vor.u32 %v3443_v54, %v2631_v56  ;;  %v2807_v19 = vld [vmem:[#allocation7 + $0x3a8] sm:$0xf0]  ;;  %v3555_v54 = vld [vmem:[#allocation9 + $0x1c4] sm:$0xf] }
  0x71   :  { %1220 = vmatpush.bf16.msrb.mxu0 %v2658_v20  ;;  %1186 = vmatmul.bf16.vlgmr.msra.gmra.mxu1 %v3792_v27  ;;  %v2618_v20 = vor.u32 %v3439_v11, %v2615_v12  ;;  %v3079_v56 = vld [vmem:[#allocation9 + $0x1e0] sm:$0xf0]  ;;  %v2949_v11 = vld [vmem:[#allocation9 + $0xc0] sm:$0xf] }
  0x72   :  { %1234 = vmatpush.bf16.msrb.mxu1 %v2722_v21  ;;  %1200 = vmatmul.bf16.vlgmr.msra.gmra.mxu2 %v3796_v40  ;;  %v3459_v40 = vld [vmem:[#allocation7 + $0x2c4] sm:$0xf]  ;;  %v2682_v21 = vor.u32 %v3455_v13, %v2679_v15  ;;  %v3519_v15 = vld [vmem:[#allocation9 + $0x9c] sm:$0xf0] }
  0x73   :  { %1248 = vmatpush.bf16.msrb.mxu2 %v2786_v22  ;;  %1214 = vmatmul.bf16.vlgmr.msra.gmra.mxu3 %v3798_v42  ;;  %v2759_v42 = vld [vmem:[#allocation7 + $0x348] sm:$0xf0]  ;;  %v2698_v61 = vor.u32 %v3459_v40, %v2695_v57  ;;  %v2746_v22 = vor.u32 %v3471_v16, %v2743_v17  ;;  %v2794_v57 = vor.u32 %v3483_v46, %v2791_v48  ;;  %v3523_v12 = vld [vmem:[#allocation9 + $0xc4] sm:$0xf] }
  0x74   :  { %1262 = vmatpush.bf16.msrb.mxu3 %v2850_v28  ;;  %v2762_v27 = vor.u32 %v3475_v58, %v2759_v42  ;;  %v2810_v28 = vor.u32 %v3487_v18, %v2807_v19  ;;  %v3082_v42 = vor.u32 %v3555_v54, %v3079_v56  ;;  %v3515_v16 = vld [vmem:[#allocation9 + $0x84] sm:$0xf]  ;;  %v3023_v56 = vld [vmem:[#allocation9 + $0x168] sm:$0xf0] }
  0x75   :  { %1221 = vmatpush.bf16.msrb.mxu0 %v2650_v34  ;;  %v2610_v34 = vor.u32 %v3437_v24, %v2607_v25  ;;  %v2919_v17 = vld [vmem:[#allocation9 + $0xa0] sm:$0xf0] }
  0x76   :  { %1235 = vmatpush.bf16.msrb.mxu1 %v2714_v35  ;;  %v3435_v35 = vld [vmem:[#allocation7 + $0x204] sm:$0xf]  ;;  %v2922_v19 = vor.u32 %v3515_v16, %v2919_v17 }
  0x77   :  { %1249 = vmatpush.bf16.msrb.mxu2 %v2778_v36  ;;  %v2674_v36 = vor.u32 %v3453_v26, %v2671_v29  ;;  %v2887_v24 = vld [vmem:[#allocation9 + $0x60] sm:$0xf0]  ;;  %v3503_v29 = vld [vmem:[#allocation9 + $0x1c] sm:$0xf0] }
  0x78   :  { %1263 = vmatpush.bf16.msrb.mxu3 %v2842_v41  ;;  %v2663_v41 = vld [vmem:[#allocation7 + $0x288] sm:$0xf0] }
  0x79   :  { %1222 = vmatpush.bf16.msrb.mxu0 %v2642_v49  ;;  %v3077_v49 = vld [vmem:[#allocation9 + $0x1c0] sm:$0xf]  ;;  %v2666_v40 = vor.u32 %v3451_v39, %v2663_v41  ;;  %v3053_v39 = vld [vmem:[#allocation9 + $0x188] sm:$0xf] }
  0x7a   :  { %1236 = vmatpush.bf16.msrb.mxu1 %v2706_v50  ;;  %v3559_v50 = vld [vmem:[#allocation9 + $0x1dc] sm:$0xf0]  ;;  %v3552_v41 = vld [vmem:[#allocation9 + $0x1a4] sm:$0xf0] }
  0x7b   :  { %1250 = vmatpush.bf16.msrb.mxu2 %v2770_v53  ;;  %v2602_v53 = vor.u32 %v3435_v35, %v2599_v38  ;;  %v3078_v58 = vor.u32 %v3559_v50, %v3077_v49  ;;  %v3560_v35 = vld [vmem:[#allocation9 + $0x1e4] sm:$0xf0]  ;;  %v3087_v38 = vld [vmem:[#allocation9 + $0x1e8] sm:$0xf0]  ;;  %v3054_v46 = vor.u32 %v3552_v41, %v3053_v39  ;;  %v3607_v39 = vld [vmem:[#allocation9 + $0x35c] sm:$0xf0] }
  0x7c   :  { %1264 = vmatpush.bf16.msrb.mxu3 %v2834_v1  ;;  %v2730_v1 = vor.u32 %v3467_v44, %v2727_v45  ;;  %v3548_v44 = vld [vmem:[#allocation9 + $0x18c] sm:$0xf]  ;;  %v3021_v49 = vld [vmem:[#allocation9 + $0x148] sm:$0xf]  ;;  %v3603_v41 = vld [vmem:[#allocation9 + $0x344] sm:$0xf] }
  0x7d   :  { %1223 = vmatpush.bf16.msrb.mxu0 %v2634_v23  ;;  %v3547_v23 = vld [vmem:[#allocation9 + $0x184] sm:$0xf]  ;;  %v3055_v45 = vld [vmem:[#allocation9 + $0x1a8] sm:$0xf0]  ;;  %v3544_v50 = vld [vmem:[#allocation9 + $0x164] sm:$0xf0] }
  0x7e   :  { %1237 = vmatpush.bf16.msrb.mxu1 %v2698_v61  ;;  %v3047_v61 = vld [vmem:[#allocation9 + $0x1a0] sm:$0xf0]  ;;  %v3058_v48 = vor.u32 %v3548_v44, %v3055_v45  ;;  %v3022_v54 = vor.u32 %v3544_v50, %v3021_v49  ;;  %v3237_v50 = vld [vmem:[#allocation9 + $0x300] sm:$0xf] }
  0x7f   :  { %1251 = vmatpush.bf16.msrb.mxu2 %v2762_v27  ;;  %v3046_v27 = vor.u32 %v3551_v60, %v3045_v59  ;;  %v3050_v62 = vor.u32 %v3547_v23, %v3047_v61  ;;  %v2991_v59 = vld [vmem:[#allocation9 + $0x128] sm:$0xf0]  ;;  %v2957_v23 = vld [vmem:[#allocation9 + $0xc8] sm:$0xf]  ;;  %v3271_v44 = vld [vmem:[#allocation9 + $0x360] sm:$0xf0] }
  0x80   :  { %1265 = vmatpush.bf16.msrb.mxu3 %v2826_v2  ;;  %v3539_v2 = vld [vmem:[#allocation9 + $0x144] sm:$0xf]  ;;  %v3528_v61 = vld [vmem:[#allocation9 + $0xe4] sm:$0xf0] }
  0x81   :  { %1224 = vmatpush.bf16.msrb.mxu0 %v2626_v8  ;;  %v3018_v5 = vor.u32 %v3539_v2, %v3015_v3  ;;  %v3531_v8 = vld [vmem:[#allocation9 + $0x104] sm:$0xf]  ;;  %v2925_v3 = vld [vmem:[#allocation9 + $0x88] sm:$0xf] }
  0x82   :  { %1238 = vmatpush.bf16.msrb.mxu1 %v2690_v9  ;;  %v2982_v9 = vor.u32 %v3535_v7, %v2981_v6 }
  0x83   :  { %1252 = vmatpush.bf16.msrb.mxu2 %v2754_v10 }
  0x84   :  { %1266 = vmatpush.bf16.msrb.mxu3 %v2818_v14  ;;  %v2917_v14 = vld [vmem:[#allocation9 + $0x80] sm:$0xf] }
  0x85   :  { %1225 = vmatpush.bf16.msrb.mxu0 %v2618_v20  ;;  %v2918_v18 = vor.u32 %v3519_v15, %v2917_v14  ;;  %v2885_v20 = vld [vmem:[#allocation9 + $0x40] sm:$0xf]  ;;  %v3504_v14 = vld [vmem:[#allocation9 + $0x24] sm:$0xf0]  ;;  %v3500_v15 = vld [vmem:[#allocation9 + $0xc] sm:$0xf] }
  0x86   :  { %1239 = vmatpush.bf16.msrb.mxu1 %v2682_v21  ;;  %v3511_v21 = vld [vmem:[#allocation9 + $0x5c] sm:$0xf0] }
  0x87   :  { %1253 = vmatpush.bf16.msrb.mxu2 %v2746_v22  ;;  %v3507_v22 = vld [vmem:[#allocation9 + $0x44] sm:$0xf]  ;;  %v2886_v25 = vor.u32 %v3511_v21, %v2885_v20  ;;  %v3333_v20 = vld [vmem:[#allocation9 + $0x3c0] sm:$0xf] }
  0x88   :  { %1267 = vmatpush.bf16.msrb.mxu3 %v2810_v28  ;;  %v2890_v26 = vor.u32 %v3507_v22, %v2887_v24  ;;  %v2853_v28 = vld [vmem:[#allocation9] sm:$0xf] }
  0x89   :  { %1226 = vmatpush.bf16.msrb.mxu0 %v2610_v34  ;;  %v2854_v31 = vor.u32 %v3503_v29, %v2853_v28  ;;  %v3085_v34 = vld [vmem:[#allocation9 + $0x1c8] sm:$0xf]  ;;  %v3623_v21 = vld [vmem:[#allocation9 + $0x3dc] sm:$0xf0]  ;;  %v3335_v28 = vld [vmem:[#allocation9 + $0x3e0] sm:$0xf0] }
  0x8a   :  { %1240 = vmatpush.bf16.msrb.mxu1 %v2674_v36  ;;  %v3556_v36 = vld [vmem:[#allocation9 + $0x1cc] sm:$0xf] }
  0x8b   :  { %1254 = vmatpush.bf16.msrb.mxu2 %v2738_v37  ;;  %v3086_v37 = vor.u32 %v3560_v35, %v3085_v34 }
  0x8c   :  { %1268 = vmatpush.bf16.msrb.mxu3 %v2802_v43  ;;  %v3090_v43 = vor.u32 %v3556_v36, %v3087_v38  ;;  %v3303_v36 = vld [vmem:[#allocation9 + $0x3a0] sm:$0xf0]  ;;  %v3269_v38 = vld [vmem:[#allocation9 + $0x340] sm:$0xf] }
  0x8d   :  { %1227 = vmatpush.bf16.msrb.mxu0 %v2602_v53  ;;  %v3540_v53 = vld [vmem:[#allocation9 + $0x14c] sm:$0xf] }
  0x8e   :  { %1241 = vmatpush.bf16.msrb.mxu1 %v2666_v40  ;;  %v3026_v40 = vor.u32 %v3540_v53, %v3023_v56  ;;  %v3599_v53 = vld [vmem:[#allocation9 + $0x31c] sm:$0xf0] }
  0x8f   :  { %1255 = vmatpush.bf16.msrb.mxu2 %v2730_v1  ;;  %v2989_v1 = vld [vmem:[#allocation9 + $0x108] sm:$0xf] }
  0x90   :  { %1269 = vmatpush.bf16.msrb.mxu3 %v2794_v57  ;;  %1228 = vmatmul.bf16.vlgmr.msrb.gmra.mxu0 %v3808_v47  ;;  %v2983_v47 = vld [vmem:[#allocation9 + $0x120] sm:$0xf0]  ;;  %v3536_v57 = vld [vmem:[#allocation9 + $0x124] sm:$0xf0] }
  0x91   :  { %2050 = vmatpush.bf16.msra.mxu0 %v3078_v58  ;;  %1242 = vmatmul.bf16.vlgmr.msrb.gmra.mxu1 %v3812_v52  ;;  %v2986_v10 = vor.u32 %v3531_v8, %v2983_v47  ;;  %v3527_v52 = vld [vmem:[#allocation9 + $0xdc] sm:$0xf0]  ;;  %v3532_v58 = vld [vmem:[#allocation9 + $0x10c] sm:$0xf] }
  0x92   :  { %1256 = vmatmul.bf16.vlgmr.msrb.gmra.mxu2 %v3810_v51  ;;  %v2951_v51 = vld [vmem:[#allocation9 + $0xe0] sm:$0xf0]  ;;  %v2950_v13 = vor.u32 %v3527_v52, %v2949_v11  ;;  %v2994_v60 = vor.u32 %v3532_v58, %v2991_v59  ;;  %v2927_v8 = vld [vmem:[#allocation9 + $0xa8] sm:$0xf0] }
  0x93   :  { %2078 = vmatpush.bf16.msra.mxu2 %v3082_v42  ;;  %1270 = vmatmul.bf16.vlgmr.msrb.gmra.mxu3 %v3814_v55  ;;  %v2954_v55 = vor.u32 %v3523_v12, %v2951_v51  ;;  %v2990_v42 = vor.u32 %v3536_v57, %v2989_v1  ;;  %v3508_v11 = vld [vmem:[#allocation9 + $0x4c] sm:$0xf]  ;;  %v3238_v1 = vor.u32 %v3599_v53, %v3237_v50  ;;  %v3239_v57 = vld [vmem:[#allocation9 + $0x320] sm:$0xf0]  ;;  %v3063_v50 = vld [vmem:[#allocation9 + $0x1b0] sm:$0xf0] }
  0x94   :  { %v2895_v12 = vld [vmem:[#allocation9 + $0x68] sm:$0xf0] }
  0x95   :  { %2051 = vmatpush.bf16.msra.mxu0 %v3046_v27  ;;  %v3524_v27 = vld [vmem:[#allocation9 + $0xcc] sm:$0xf]  ;;  %v2898_v51 = vor.u32 %v3508_v11, %v2895_v12  ;;  %v3175_v11 = vld [vmem:[#allocation9 + $0x2a0] sm:$0xf0] }
  0x96   :  { %v2962_v0 = vor.u32 %v3524_v27, %v2959_v63 }
  0x97   :  { %2079 = vmatpush.bf16.msra.mxu2 %v3050_v62  ;;  %v2958_v62 = vor.u32 %v3528_v61, %v2957_v23  ;;  %v3591_v23 = vld [vmem:[#allocation9 + $0x2dc] sm:$0xf0]  ;;  %v3587_v61 = vld [vmem:[#allocation9 + $0x2c4] sm:$0xf] }
  0x99   :  { %2052 = vmatpush.bf16.msra.mxu0 %v3014_v4  ;;  %v3520_v4 = vld [vmem:[#allocation9 + $0xa4] sm:$0xf0] }
  0x9a   :  { %v2926_v7 = vor.u32 %v3520_v4, %v2925_v3  ;;  %v3173_v4 = vld [vmem:[#allocation9 + $0x280] sm:$0xf] }
  0x9b   :  { %2080 = vmatpush.bf16.msra.mxu2 %v3018_v5  ;;  %v3516_v5 = vld [vmem:[#allocation9 + $0x8c] sm:$0xf] }
  0x9c   :  { %v2930_v47 = vor.u32 %v3516_v5, %v2927_v8  ;;  %v3583_v5 = vld [vmem:[#allocation9 + $0x29c] sm:$0xf0] }
  0x9d   :  { %2053 = vmatpush.bf16.msra.mxu0 %v2982_v9  ;;  %v2893_v9 = vld [vmem:[#allocation9 + $0x48] sm:$0xf] }
  0x9f   :  { %2081 = vmatpush.bf16.msra.mxu2 %v2986_v10  ;;  %v3512_v10 = vld [vmem:[#allocation9 + $0x64] sm:$0xf0] }
  0xa0   :  { %v2894_v52 = vor.u32 %v3512_v10, %v2893_v9  ;;  %v3174_v10 = vor.u32 %v3583_v5, %v3173_v4  ;;  %v2997_v4 = vld [vmem:[#allocation9 + $0x110] sm:$0xf] }
  0xa1   :  { %2054 = vmatpush.bf16.msra.mxu0 %v2950_v13 }
  0xa3   :  { %2082 = vmatpush.bf16.msra.mxu2 %v2954_v55  ;;  %v2861_v55 = vld [vmem:[#allocation9 + $0x8] sm:$0xf] }
  0xa5   :  { %2055 = vmatpush.bf16.msra.mxu0 %v2918_v18  ;;  %v2862_v18 = vor.u32 %v3504_v14, %v2861_v55  ;;  %v3141_v55 = vld [vmem:[#allocation9 + $0x240] sm:$0xf] }
  0xa6   :  { %v3575_v14 = vld [vmem:[#allocation9 + $0x25c] sm:$0xf0] }
  0xa7   :  { %2083 = vmatpush.bf16.msra.mxu2 %v2922_v19  ;;  %v2863_v19 = vld [vmem:[#allocation9 + $0x28] sm:$0xf0] }
  0xa8   :  { %v2866_v24 = vor.u32 %v3500_v15, %v2863_v19  ;;  %v3571_v15 = vld [vmem:[#allocation9 + $0x244] sm:$0xf] }
  0xa9   :  { %2056 = vmatpush.bf16.msra.mxu0 %v2886_v25  ;;  %v3334_v25 = vor.u32 %v3623_v21, %v3333_v20  ;;  %v3093_v20 = vld [vmem:[#allocation9 + $0x1d0] sm:$0xf] }
  0xaa   :  { %v3561_v21 = vld [vmem:[#allocation9 + $0x1ec] sm:$0xf0] }
  0xab   :  { %2084 = vmatpush.bf16.msra.mxu2 %v2890_v26  ;;  %v3619_v26 = vld [vmem:[#allocation9 + $0x3c4] sm:$0xf]  ;;  %2064 = vmatpush.bf16.msra.mxu1 %v3334_v25  ;;  %v3567_v25 = vld [vmem:[#allocation9 + $0x21c] sm:$0xf0] }
  0xac   :  { %v3338_v30 = vor.u32 %v3619_v26, %v3335_v28  ;;  %v3563_v26 = vld [vmem:[#allocation9 + $0x204] sm:$0xf] }
  0xad   :  { %2057 = vmatpush.bf16.msra.mxu0 %v2854_v31  ;;  %v3301_v31 = vld [vmem:[#allocation9 + $0x380] sm:$0xf] }
  0xae   :  { %2092 = vmatpush.bf16.msra.mxu3 %v3338_v30  ;;  %v3302_v35 = vor.u32 %v3615_v32, %v3301_v31  ;;  %v3557_v30 = vld [vmem:[#allocation9 + $0x1d4] sm:$0xf] }
  0xaf   :  { %2085 = vmatpush.bf16.msra.mxu2 %v2858_v33  ;;  %v3611_v33 = vld [vmem:[#allocation9 + $0x384] sm:$0xf]  ;;  %v3095_v31 = vld [vmem:[#allocation9 + $0x1f0] sm:$0xf0] }
  0xb0   :  { %2065 = vmatpush.bf16.msra.mxu1 %v3302_v35 }
  0xb1   :  { %2106 = vmatpush.bf16.msrb.mxu0 %v3086_v37  ;;  %v3306_v37 = vor.u32 %v3611_v33, %v3303_v36  ;;  %v3111_v33 = vld [vmem:[#allocation9 + $0x220] sm:$0xf0]  ;;  %v3341_v36 = vld [vmem:[#allocation9 + $0x3c8] sm:$0xf] }
  0xb2   :  { %v1075_v6 = vpop.f32.mrf.mxu1 }
  0xb3   :  { %2134 = vmatpush.bf16.msrb.mxu2 %v3090_v43  ;;  %v1061_v2 = vpop.f32.mrf.mxu0  ;;  %v3270_v43 = vor.u32 %v3607_v39, %v3269_v38  ;;  %2093 = vmatpush.bf16.msra.mxu3 %v3306_v37  ;;  %v3624_v37 = vld [vmem:[#allocation9 + $0x3e4] sm:$0xf0]  ;;  %v3620_v38 = vld [vmem:[#allocation9 + $0x3cc] sm:$0xf]  ;;  %v3094_v39 = vor.u32 %v3561_v21, %v3093_v20 }
  0xb4   :  { %v1076_v16 = vadd.f32 %v1075_v6, %v1061_v2  ;;  %v3579_v6 = vld [vmem:[#allocation9 + $0x284] sm:$0xf]  ;;  %v3592_v20 = vld [vmem:[#allocation9 + $0x2e4] sm:$0xf0]  ;;  %v3588_v21 = vld [vmem:[#allocation9 + $0x2cc] sm:$0xf] }
  0xb5   :  { %2107 = vmatpush.bf16.msrb.mxu0 %v3054_v46  ;;  %2066 = vmatpush.bf16.msra.mxu1 %v3270_v43  ;;  %v3061_v43 = vld [vmem:[#allocation9 + $0x190] sm:$0xf] }
  0xb7   :  { %2135 = vmatpush.bf16.msrb.mxu2 %v3058_v48  ;;  %v3274_v48 = vor.u32 %v3603_v41, %v3271_v44  ;;  %v3098_v41 = vor.u32 %v3557_v30, %v3095_v31  ;;  %v3553_v44 = vld [vmem:[#allocation9 + $0x1ac] sm:$0xf0]  ;;  %v3517_v30 = vld [vmem:[#allocation9 + $0x94] sm:$0xf] }
  0xb8   :  { %v2935_v31 = vld [vmem:[#allocation9 + $0xb0] sm:$0xf0] }
  0xb9   :  { %2108 = vmatpush.bf16.msrb.mxu0 %v3022_v54  ;;  %v3595_v54 = vld [vmem:[#allocation9 + $0x304] sm:$0xf]  ;;  %2094 = vmatpush.bf16.msra.mxu3 %v3274_v48 }
  0xba   :  { %v1077_v29 = vpop.f32.mrf.mxu1  ;;  %v3242_v59 = vor.u32 %v3595_v54, %v3239_v57  ;;  %2067 = vmatpush.bf16.msra.mxu1 %v3238_v1  ;;  %v3309_v54 = vld [vmem:[#allocation9 + $0x388] sm:$0xf]  ;;  %v3062_v1 = vor.u32 %v3553_v44, %v3061_v43  ;;  %v3513_v43 = vld [vmem:[#allocation9 + $0x6c] sm:$0xf0]  ;;  %v3509_v44 = vld [vmem:[#allocation9 + $0x54] sm:$0xf] }
  0xbb   :  { %2136 = vmatpush.bf16.msrb.mxu2 %v3026_v40  ;;  %v1089_v13 = vpop.f32.mrf.mxu2  ;;  %v1063_v22 = vpop.f32.mrf.mxu0 }
  0xbc   :  { %v1103_v17 = vpop.f32.mrf.mxu3  ;;  %v1090_v34 = vadd.f32 %v1089_v13, %v1076_v16  ;;  %v1078_v56 = vadd.f32 %v1077_v29, %v1063_v22  ;;  %v3142_v16 = vor.u32 %v3575_v14, %v3141_v55  ;;  %v3247_v14 = vld [vmem:[#allocation9 + $0x328] sm:$0xf0] }
  0xbd   :  { %2109 = vmatpush.bf16.msrb.mxu0 %v2990_v42  ;;  %2095 = vmatpush.bf16.msra.mxu3 %v3242_v59  ;;  %v3311_v59 = vld [vmem:[#allocation9 + $0x3a8] sm:$0xf0] }
  0xbe   :  { %v1104_v45 = vadd.f32 %v1103_v17, %v1090_v34  ;;  %v3143_v17 = vld [vmem:[#allocation9 + $0x260] sm:$0xf0]  ;;  %v3114_v34 = vor.u32 %v3563_v26, %v3111_v33  ;;  %v3181_v33 = vld [vmem:[#allocation9 + $0x288] sm:$0xf] }
  0xbf   :  { %2137 = vmatpush.bf16.msrb.mxu2 %v2994_v60  ;;  %v3205_v60 = vld [vmem:[#allocation9 + $0x2c0] sm:$0xf] }
  0xc0   :  { %v3206_v63 = vor.u32 %v3591_v23, %v3205_v60  ;;  %v3545_v60 = vld [vmem:[#allocation9 + $0x16c] sm:$0xf0]  ;;  %v3541_v23 = vld [vmem:[#allocation9 + $0x154] sm:$0xf] }
  0xc1   :  { %2110 = vmatpush.bf16.msrb.mxu0 %v2958_v62 }
  0xc2   :  { %2068 = vmatpush.bf16.msra.mxu1 %v3206_v63  ;;  %v3608_v63 = vld [vmem:[#allocation9 + $0x364] sm:$0xf0] }
  0xc3   :  { %2138 = vmatpush.bf16.msrb.mxu2 %v2962_v0  ;;  %v1091_v46 = vpop.f32.mrf.mxu2  ;;  %v3207_v0 = vld [vmem:[#allocation9 + $0x2e0] sm:$0xf0] }
  0xc4   :  { %v1105_v49 = vpop.f32.mrf.mxu3  ;;  %v1092_v27 = vadd.f32 %v1091_v46, %v1078_v56  ;;  %v3210_v2 = vor.u32 %v3587_v61, %v3207_v0  ;;  %v3343_v46 = vld [vmem:[#allocation9 + $0x3e8] sm:$0xf0]  ;;  %v3616_v56 = vld [vmem:[#allocation9 + $0x3a4] sm:$0xf0]  ;;  %v3031_v61 = vld [vmem:[#allocation9 + $0x170] sm:$0xf0] }
  0xc5   :  { %2111 = vmatpush.bf16.msrb.mxu0 %v2926_v7  ;;  %v3346_v53 = vor.u32 %v3620_v38, %v3343_v46  ;;  %v3604_v0 = vld [vmem:[#allocation9 + $0x34c] sm:$0xf]  ;;  %v2901_v38 = vld [vmem:[#allocation9 + $0x50] sm:$0xf] }
  0xc6   :  { %v1106_v7 = vadd.f32 %v1105_v49, %v1092_v27  ;;  %2096 = vmatpush.bf16.msra.mxu3 %v3210_v2  ;;  %2069 = vmatpush.bf16.msra.mxu1 %v3174_v10  ;;  %v3549_v49 = vld [vmem:[#allocation9 + $0x194] sm:$0xf]  ;;  %v3245_v10 = vld [vmem:[#allocation9 + $0x308] sm:$0xf] }
  0xc7   :  { %2139 = vmatpush.bf16.msrb.mxu2 %v2930_v47  ;;  %v3066_v57 = vor.u32 %v3549_v49, %v3063_v50  ;;  %v3149_v50 = vld [vmem:[#allocation9 + $0x248] sm:$0xf] }
  0xc9   :  { %2112 = vmatpush.bf16.msrb.mxu0 %v2894_v52  ;;  %v3178_v52 = vor.u32 %v3579_v6, %v3175_v11  ;;  %v3279_v6 = vld [vmem:[#allocation9 + $0x368] sm:$0xf0]  ;;  %v3600_v11 = vld [vmem:[#allocation9 + $0x324] sm:$0xf0] }
  0xca   :  { %2070 = vmatpush.bf16.msra.mxu1 %v3142_v16  ;;  %v3246_v55 = vor.u32 %v3600_v11, %v3245_v10  ;;  %v3525_v16 = vld [vmem:[#allocation9 + $0xd4] sm:$0xf]  ;;  %v3069_v11 = vld [vmem:[#allocation9 + $0x198] sm:$0xf] }
  0xcb   :  { %2140 = vmatpush.bf16.msrb.mxu2 %v2898_v51  ;;  %2097 = vmatpush.bf16.msra.mxu3 %v3178_v52  ;;  %v3596_v52 = vld [vmem:[#allocation9 + $0x30c] sm:$0xf] }
  0xcd   :  { %2113 = vmatpush.bf16.msrb.mxu0 %v2862_v18  ;;  %v1117_v40 = vpop.f32.mrf.mxu0  ;;  %v3146_v18 = vor.u32 %v3571_v15, %v3143_v17  ;;  %v3529_v15 = vld [vmem:[#allocation9 + $0xec] sm:$0xf0]  ;;  %v2967_v17 = vld [vmem:[#allocation9 + $0xf0] sm:$0xf0] }
  0xce   :  { %v1118_v58 = vadd.f32 %v1117_v40, %v1104_v45  ;;  %v1131_v42 = vpop.f32.mrf.mxu1  ;;  %v3342_v45 = vor.u32 %v3624_v37, %v3341_v36  ;;  %v3612_v40 = vld [vmem:[#allocation9 + $0x38c] sm:$0xf]  ;;  %v2938_v37 = vor.u32 %v3517_v30, %v2935_v31  ;;  %v3534_v30 = vld [vmem:[#allocation9 + $0x11c] sm:$0xf] }
  0xcf   :  { %2141 = vmatpush.bf16.msrb.mxu2 %v2866_v24  ;;  %v3109_v24 = vld [vmem:[#allocation9 + $0x200] sm:$0xf]  ;;  %2098 = vmatpush.bf16.msra.mxu3 %v3146_v18  ;;  %v3314_v27 = vor.u32 %v3612_v40, %v3311_v59  ;;  %v3250_v18 = vor.u32 %v3596_v52, %v3247_v14  ;;  %v3007_v31 = vld [vmem:[#allocation9 + $0x138] sm:$0xf0] }
  0xd0   :  { %v1132_v62 = vadd.f32 %v1131_v42, %v1118_v58  ;;  %v3110_v32 = vor.u32 %v3567_v25, %v3109_v24  ;;  %v3029_v58 = vld [vmem:[#allocation9 + $0x150] sm:$0xf]  ;;  %v3310_v42 = vor.u32 %v3616_v56, %v3309_v54  ;;  %v2970_v24 = vor.u32 %v3525_v16, %v2967_v17  ;;  %v3572_v54 = vld [vmem:[#allocation9 + $0x24c] sm:$0xf] }
  0xd1   :  { %v3030_v2 = vor.u32 %v3545_v60, %v3029_v58  ;;  %v2933_v25 = vld [vmem:[#allocation9 + $0x90] sm:$0xf]  ;;  %v2902_v56 = vor.u32 %v3513_v43, %v2901_v38  ;;  %v3501_v60 = vld [vmem:[#allocation9 + $0x14] sm:$0xf]  ;;  %v3010_v38 = vor.u32 %v3534_v30, %v3007_v31  ;;  %v3530_v43 = vld [vmem:[#allocation9 + $0xf4] sm:$0xf0] }
  0xd2   :  { %2071 = vmatpush.bf16.msra.mxu1 %v3110_v32  ;;  %v3285_v30 = vld [vmem:[#allocation9 + $0x350] sm:$0xf] }
  0xd3   :  { %2099 = vmatpush.bf16.msra.mxu3 %v3114_v34  ;;  %v3584_v34 = vld [vmem:[#allocation9 + $0x2a4] sm:$0xf0]  ;;  %v3609_v31 = vld [vmem:[#allocation9 + $0x36c] sm:$0xf0] }
  0xd5   :  { %v1145_v3 = vpop.f32.mrf.mxu2  ;;  %v1119_v47 = vpop.f32.mrf.mxu0 }
  0xd6   :  { %v1146_v8 = vadd.f32 %v1145_v3, %v1132_v62  ;;  %v1159_v9 = vpop.f32.mrf.mxu3  ;;  %v1120_v12 = vadd.f32 %v1119_v47, %v1106_v7  ;;  %v1133_v13 = vpop.f32.mrf.mxu1  ;;  %2120 = vmatpush.bf16.msrb.mxu1 %v3342_v45  ;;  %v3277_v62 = vld [vmem:[#allocation9 + $0x348] sm:$0xf]  ;;  %v3034_v3 = vor.u32 %v3541_v23, %v3031_v61  ;;  %v3537_v7 = vld [vmem:[#allocation9 + $0x12c] sm:$0xf0]  ;;  %v2999_v47 = vld [vmem:[#allocation9 + $0x130] sm:$0xf0] }
  0xd7   :  { %2148 = vmatpush.bf16.msrb.mxu3 %v3346_v53  ;;  %v3278_v5 = vor.u32 %v3608_v63, %v3277_v62  ;;  %v2903_v45 = vld [vmem:[#allocation9 + $0x70] sm:$0xf0]  ;;  %v3576_v53 = vld [vmem:[#allocation9 + $0x264] sm:$0xf0]  ;;  %v3101_v61 = vld [vmem:[#allocation9 + $0x1d8] sm:$0xf] }
  0xd8   :  { %v1160_v51 = vadd.f32 %v1159_v9, %v1146_v8  ;;  %v1134_v19 = vadd.f32 %v1133_v13, %v1120_v12  ;;  %v3533_v8 = vld [vmem:[#allocation9 + $0x114] sm:$0xf]  ;;  %v3282_v9 = vor.u32 %v3604_v0, %v3279_v6  ;;  %v2998_v12 = vor.u32 %v3537_v7, %v2997_v4  ;;  %v2965_v13 = vld [vmem:[#allocation9 + $0xd0] sm:$0xf]  ;;  %v3562_v62 = vld [vmem:[#allocation9 + $0x1f4] sm:$0xf0] }
  0xd9   :  { %v2906_v40 = vor.u32 %v3509_v44, %v2903_v45  ;;  %v3150_v58 = vor.u32 %v3576_v53, %v3149_v50  ;;  %v2871_v23 = vld [vmem:[#allocation9 + $0x30] sm:$0xf0]  ;;  %v3558_v63 = vld [vmem:[#allocation9 + $0x1dc] sm:$0xf]  ;;  %v3564_v4 = vld [vmem:[#allocation9 + $0x20c] sm:$0xf] }
  0xda   :  { %1276 = vst [vmem:[%s3912_s4] sm:$0xff] %v1160_v51  ;;  %2121 = vmatpush.bf16.msrb.mxu1 %v3310_v42  ;;  %v3151_v42 = vld [vmem:[#allocation9 + $0x268] sm:$0xf0]  ;;  %v3103_v0 = vld [vmem:[#allocation9 + $0x1f8] sm:$0xf0]  ;;  %v2874_v6 = vor.u32 %v3501_v60, %v2871_v23 }
  0xdb   :  { %2149 = vmatpush.bf16.msrb.mxu3 %v3314_v27  ;;  %v3154_v27 = vor.u32 %v3572_v54, %v3151_v42  ;;  %v3106_v10 = vor.u32 %v3558_v63, %v3103_v0  ;;  %v3526_v44 = vld [vmem:[#allocation9 + $0xdc] sm:$0xf]  ;;  %v2941_v54 = vld [vmem:[#allocation9 + $0x98] sm:$0xf] }
  0xdc   :  { %v2975_v45 = vld [vmem:[#allocation9 + $0xf8] sm:$0xf0] }
  0xdd   :  { %v1147_v22 = vpop.f32.mrf.mxu2  ;;  %v2978_v53 = vor.u32 %v3526_v44, %v2975_v45  ;;  %v3221_v44 = vld [vmem:[#allocation9 + $0x2d0] sm:$0xf] }
  0xde   :  { %v1148_v28 = vadd.f32 %v1147_v22, %v1134_v19  ;;  %v1161_v29 = vpop.f32.mrf.mxu3  ;;  %2122 = vmatpush.bf16.msrb.mxu1 %v3278_v5  ;;  %v3213_v19 = vld [vmem:[#allocation9 + $0x2c8] sm:$0xf]  ;;  %v2966_v22 = vor.u32 %v3529_v15, %v2965_v13  ;;  %v3071_v13 = vld [vmem:[#allocation9 + $0x1b8] sm:$0xf0]  ;;  %v3593_v45 = vld [vmem:[#allocation9 + $0x2ec] sm:$0xf0] }
  0xdf   :  { %2150 = vmatpush.bf16.msrb.mxu3 %v3282_v9  ;;  %v3214_v26 = vor.u32 %v3592_v20, %v3213_v19  ;;  %v3102_v9 = vor.u32 %v3562_v62, %v3101_v61  ;;  %v3546_v19 = vld [vmem:[#allocation9 + $0x174] sm:$0xf0]  ;;  %v3542_v20 = vld [vmem:[#allocation9 + $0x15c] sm:$0xf] }
  0xe0   :  { %v1162_v35 = vadd.f32 %v1161_v29, %v1148_v28  ;;  %v3215_v28 = vld [vmem:[#allocation9 + $0x2e8] sm:$0xf0]  ;;  %v3521_v29 = vld [vmem:[#allocation9 + $0xac] sm:$0xf0]  ;;  %v2909_v62 = vld [vmem:[#allocation9 + $0x58] sm:$0xf] }
  0xe1   :  { %v3218_v32 = vor.u32 %v3588_v21, %v3215_v28  ;;  %v2934_v36 = vor.u32 %v3521_v29, %v2933_v25  ;;  %v3039_v21 = vld [vmem:[#allocation9 + $0x178] sm:$0xf0]  ;;  %v3005_v28 = vld [vmem:[#allocation9 + $0x118] sm:$0xf] }
  0xe2   :  { %1278 = vst [vmem:[%s3912_s4 + $0x10] sm:$0xff] %v1162_v35  ;;  %v3834_v48 = vpack.c.bf16 %v1162_v35, %v1160_v51  ;;  %v3002_v51 = vor.u32 %v3533_v8, %v2999_v47  ;;  %2123 = vmatpush.bf16.msrb.mxu1 %v3246_v55  ;;  %v3580_v35 = vld [vmem:[#allocation9 + $0x28c] sm:$0xf]  ;;  %v3538_v29 = vld [vmem:[#allocation9 + $0x134] sm:$0xf0] }
  0xe3   :  { %2151 = vmatpush.bf16.msrb.mxu3 %v3250_v18  ;;  %v3119_v8 = vld [vmem:[#allocation9 + $0x228] sm:$0xf0]  ;;  %v3037_v18 = vld [vmem:[#allocation9 + $0x158] sm:$0xf] }
  0xe4   :  { %2058 = vmatmul.bf16.vlgmr.msra.gmra.mxu0 %v3834_v48  ;;  %2086 = vmatmul.bf16.vlgmr.msra.gmra.mxu2 %v3834_v48  ;;  %v3122_v55 = vor.u32 %v3564_v4, %v3119_v8  ;;  %v3038_v25 = vor.u32 %v3546_v19, %v3037_v18  ;;  %v2911_v4 = vld [vmem:[#allocation9 + $0x78] sm:$0xf0]  ;;  %v2877_v8 = vld [vmem:[#allocation9 + $0x18] sm:$0xf] }
  0xe5   :  { %2162 = vmatpush.bf16.msra.mxu0 %v3094_v39  ;;  %2190 = vmatpush.bf16.msra.mxu2 %v3098_v41  ;;  %v3182_v39 = vor.u32 %v3584_v34, %v3181_v33  ;;  %v3183_v41 = vld [vmem:[#allocation9 + $0x2a8] sm:$0xf0] }
  0xe6   :  { %2124 = vmatpush.bf16.msrb.mxu1 %v3214_v26  ;;  %v3186_v46 = vor.u32 %v3580_v35, %v3183_v41  ;;  %v3042_v26 = vor.u32 %v3542_v20, %v3039_v21  ;;  %v3317_v21 = vld [vmem:[#allocation9 + $0x390] sm:$0xf] }
  0xe7   :  { %2152 = vmatpush.bf16.msrb.mxu3 %v3218_v32 }
  0xe9   :  { %2163 = vmatpush.bf16.msra.mxu0 %v3062_v1  ;;  %2191 = vmatpush.bf16.msra.mxu2 %v3066_v57  ;;  %v2869_v1 = vld [vmem:[#allocation9 + $0x10] sm:$0xf] }
  0xea   :  { %2125 = vmatpush.bf16.msrb.mxu1 %v3182_v39  ;;  %v3505_v57 = vld [vmem:[#allocation9 + $0x2c] sm:$0xf0]  ;;  %v2973_v39 = vld [vmem:[#allocation9 + $0xd8] sm:$0xf] }
  0xeb   :  { %2153 = vmatpush.bf16.msrb.mxu3 %v3186_v46  ;;  %v2870_v5 = vor.u32 %v3505_v57, %v2869_v1  ;;  %v2974_v50 = vor.u32 %v3530_v43, %v2973_v39  ;;  %v3518_v1 = vld [vmem:[#allocation9 + $0x9c] sm:$0xf]  ;;  %v3255_v39 = vld [vmem:[#allocation9 + $0x330] sm:$0xf0] }
  0xec   :  { %v2943_v57 = vld [vmem:[#allocation9 + $0xb8] sm:$0xf0] }
  0xed   :  { %2164 = vmatpush.bf16.msra.mxu0 %v3030_v2  ;;  %2192 = vmatpush.bf16.msra.mxu2 %v3034_v3  ;;  %v1173_v49 = vpop.f32.mrf.mxu0  ;;  %v3117_v2 = vld [vmem:[#allocation9 + $0x208] sm:$0xf] }
  0xee   :  { %v1187_v59 = vpop.f32.mrf.mxu1  ;;  %2126 = vmatpush.bf16.msrb.mxu1 %v3150_v58  ;;  %v3568_v3 = vld [vmem:[#allocation9 + $0x224] sm:$0xf0] }
  0xef   :  { %v3118_v7 = vor.u32 %v3568_v3, %v3117_v2  ;;  %2154 = vmatpush.bf16.msrb.mxu3 %v3154_v27  ;;  %v1188_v14 = vadd.f32 %v1187_v59, %v1173_v49  ;;  %v2946_v27 = vor.u32 %v3518_v1, %v2943_v57  ;;  %v3514_v2 = vld [vmem:[#allocation9 + $0x74] sm:$0xf0]  ;;  %v3510_v3 = vld [vmem:[#allocation9 + $0x5c] sm:$0xf] }
  0xf1   :  { %2165 = vmatpush.bf16.msra.mxu0 %v2998_v12  ;;  %2193 = vmatpush.bf16.msra.mxu2 %v3002_v51  ;;  %v3554_v12 = vld [vmem:[#allocation9 + $0x1b4] sm:$0xf0]  ;;  %v3550_v51 = vld [vmem:[#allocation9 + $0x19c] sm:$0xf] }
  0xf2   :  { %2127 = vmatpush.bf16.msrb.mxu1 %v3118_v7  ;;  %v3070_v16 = vor.u32 %v3554_v12, %v3069_v11  ;;  %v3074_v17 = vor.u32 %v3550_v51, %v3071_v13  ;;  %v2914_v7 = vor.u32 %v3510_v3, %v2911_v4  ;;  %v2879_v11 = vld [vmem:[#allocation9 + $0x38] sm:$0xf0]  ;;  %v3349_v12 = vld [vmem:[#allocation9 + $0x3d0] sm:$0xf]  ;;  %v3626_v3 = vld [vmem:[#allocation9 + $0x3f4] sm:$0xf0] }
  0xf3   :  { %2155 = vmatpush.bf16.msrb.mxu3 %v3122_v55  ;;  %v3625_v13 = vld [vmem:[#allocation9 + $0x3ec] sm:$0xf0]  ;;  %v3621_v55 = vld [vmem:[#allocation9 + $0x3d4] sm:$0xf]  ;;  %v3622_v4 = vld [vmem:[#allocation9 + $0x3dc] sm:$0xf] }
  0xf4   :  { %2114 = vmatmul.bf16.vlgmr.msrb.gmra.mxu0 %v3834_v48  ;;  %2142 = vmatmul.bf16.vlgmr.msrb.gmra.mxu2 %v3834_v48  ;;  %v3350_v19 = vor.u32 %v3625_v13, %v3349_v12  ;;  %v3293_v13 = vld [vmem:[#allocation9 + $0x358] sm:$0xf] }
  0xf5   :  { %2166 = vmatpush.bf16.msra.mxu0 %v2966_v22  ;;  %2194 = vmatpush.bf16.msra.mxu2 %v2970_v24  ;;  %v1201_v47 = vpop.f32.mrf.mxu2  ;;  %v1175_v15 = vpop.f32.mrf.mxu0 }
  0xf6   :  { %v1215_v52 = vpop.f32.mrf.mxu3  ;;  %v1189_v22 = vpop.f32.mrf.mxu1  ;;  %v1202_v24 = vadd.f32 %v1201_v47, %v1188_v14  ;;  %v3351_v14 = vld [vmem:[#allocation9 + $0x3f0] sm:$0xf0] }
  0xf7   :  { %v1190_v34 = vadd.f32 %v1189_v22, %v1175_v15  ;;  %v3354_v20 = vor.u32 %v3621_v55, %v3351_v14  ;;  %v3617_v22 = vld [vmem:[#allocation9 + $0x3ac] sm:$0xf0]  ;;  %v3610_v55 = vld [vmem:[#allocation9 + $0x374] sm:$0xf0]  ;;  %v3606_v14 = vld [vmem:[#allocation9 + $0x35c] sm:$0xf] }
  0xf8   :  { %v1216_v33 = vadd.f32 %v1215_v52, %v1202_v24 }
  0xf9   :  { %2167 = vmatpush.bf16.msra.mxu0 %v2934_v36  ;;  %2195 = vmatpush.bf16.msra.mxu2 %v2938_v37  ;;  %v3006_v37 = vor.u32 %v3538_v29, %v3005_v28  ;;  %v3318_v28 = vor.u32 %v3617_v22, %v3317_v21  ;;  %v3263_v21 = vld [vmem:[#allocation9 + $0x338] sm:$0xf0] }
  0xfd   :  { %2168 = vmatpush.bf16.msra.mxu0 %v2902_v56  ;;  %2196 = vmatpush.bf16.msra.mxu2 %v2906_v40  ;;  %v1203_v32 = vpop.f32.mrf.mxu2  ;;  %v3522_v40 = vld [vmem:[#allocation9 + $0xb4] sm:$0xf0] }
  0xfe   :  { %v1217_v35 = vpop.f32.mrf.mxu3  ;;  %v1204_v49 = vadd.f32 %v1203_v32, %v1190_v34  ;;  %v2942_v61 = vor.u32 %v3522_v40, %v2941_v54  ;;  %v3605_v32 = vld [vmem:[#allocation9 + $0x354] sm:$0xf]  ;;  %v3286_v34 = vor.u32 %v3609_v31, %v3285_v30  ;;  %v3585_v54 = vld [vmem:[#allocation9 + $0x2ac] sm:$0xf0]  ;;  %v3231_v30 = vld [vmem:[#allocation9 + $0x2f8] sm:$0xf0] }
  0xff   :  { %v3191_v40 = vld [vmem:[#allocation9 + $0x2b0] sm:$0xf0] }
 0x100   :  { %v1218_v42 = vadd.f32 %v1217_v35, %v1204_v49  ;;  %v3223_v49 = vld [vmem:[#allocation9 + $0x2f0] sm:$0xf0] }
 0x101   :  { %2169 = vmatpush.bf16.msra.mxu0 %v2870_v5  ;;  %2197 = vmatpush.bf16.msra.mxu2 %v2874_v6  ;;  %v2910_v6 = vor.u32 %v3514_v2, %v2909_v62  ;;  %v3569_v62 = vld [vmem:[#allocation9 + $0x22c] sm:$0xf0]  ;;  %v3357_v2 = vld [vmem:[#allocation9 + $0x3d8] sm:$0xf] }
 0x104   :  { %2170 = vmatmul.bf16.vlgmr.msra.gmra.mxu0 %v3834_v48  ;;  %2198 = vmatmul.bf16.vlgmr.msra.gmra.mxu2 %v3834_v48 }
 0x105   :  { %2218 = vmatpush.bf16.msrb.mxu0 %v3102_v9  ;;  %2246 = vmatpush.bf16.msrb.mxu2 %v3106_v10  ;;  %v3506_v9 = vld [vmem:[#allocation9 + $0x34] sm:$0xf0]  ;;  %v3502_v10 = vld [vmem:[#allocation9 + $0x1c] sm:$0xf] }
 0x109   :  { %2219 = vmatpush.bf16.msrb.mxu0 %v3070_v16  ;;  %2247 = vmatpush.bf16.msrb.mxu2 %v3074_v17  ;;  %v2878_v16 = vor.u32 %v3506_v9, %v2877_v8  ;;  %v2882_v17 = vor.u32 %v3502_v10, %v2879_v11  ;;  %v3358_v8 = vor.u32 %v3626_v3, %v3357_v2  ;;  %v3325_v9 = vld [vmem:[#allocation9 + $0x398] sm:$0xf]  ;;  %v3614_v11 = vld [vmem:[#allocation9 + $0x39c] sm:$0xf] }
 0x10a   :  { %v3618_v10 = vld [vmem:[#allocation9 + $0x3b4] sm:$0xf0] }
 0x10b   :  { %v3326_v12 = vor.u32 %v3618_v10, %v3325_v9 }
 0x10d   :  { %v1229_v36 = vpop.f32.mrf.mxu0  ;;  %2220 = vmatpush.bf16.msrb.mxu0 %v3038_v25  ;;  %2248 = vmatpush.bf16.msrb.mxu2 %v3042_v26  ;;  %v3613_v25 = vld [vmem:[#allocation9 + $0x394] sm:$0xf] }
 0x10e   :  { %v1230_v41 = vadd.f32 %v1229_v36, %v1216_v33  ;;  %v1243_v46 = vpop.f32.mrf.mxu1  ;;  %v3319_v26 = vld [vmem:[#allocation9 + $0x3b0] sm:$0xf0]  ;;  %v3253_v36 = vld [vmem:[#allocation9 + $0x310] sm:$0xf] }
 0x10f   :  { %v3322_v29 = vor.u32 %v3613_v25, %v3319_v26  ;;  %v3287_v33 = vld [vmem:[#allocation9 + $0x370] sm:$0xf0]  ;;  %v3229_v26 = vld [vmem:[#allocation9 + $0x2d8] sm:$0xf] }
 0x110   :  { %v1244_v56 = vadd.f32 %v1243_v46, %v1230_v41  ;;  %v3290_v35 = vor.u32 %v3605_v32, %v3287_v33  ;;  %v3589_v46 = vld [vmem:[#allocation9 + $0x2d4] sm:$0xf]  ;;  %v3197_v33 = vld [vmem:[#allocation9 + $0x298] sm:$0xf] }
 0x111   :  { %2221 = vmatpush.bf16.msrb.mxu0 %v3006_v37  ;;  %2249 = vmatpush.bf16.msrb.mxu2 %v3010_v38  ;;  %v3601_v37 = vld [vmem:[#allocation9 + $0x32c] sm:$0xf0]  ;;  %v3597_v38 = vld [vmem:[#allocation9 + $0x314] sm:$0xf] }
 0x112   :  { %v3254_v41 = vor.u32 %v3601_v37, %v3253_v36  ;;  %v3258_v43 = vor.u32 %v3597_v38, %v3255_v39  ;;  %v3199_v36 = vld [vmem:[#allocation9 + $0x2b8] sm:$0xf0]  ;;  %v3165_v39 = vld [vmem:[#allocation9 + $0x258] sm:$0xf] }
 0x115   :  { %v1257_v58 = vpop.f32.mrf.mxu2  ;;  %v1231_v23 = vpop.f32.mrf.mxu0  ;;  %2222 = vmatpush.bf16.msrb.mxu0 %v2974_v50  ;;  %2250 = vmatpush.bf16.msrb.mxu2 %v2978_v53  ;;  %v3226_v50 = vor.u32 %v3589_v46, %v3223_v49  ;;  %v3189_v53 = vld [vmem:[#allocation9 + $0x290] sm:$0xf]  ;;  %v3133_v49 = vld [vmem:[#allocation9 + $0x218] sm:$0xf] }
 0x116   :  { %v1258_v59 = vadd.f32 %v1257_v58, %v1244_v56  ;;  %v1271_v60 = vpop.f32.mrf.mxu3  ;;  %v1232_v0 = vadd.f32 %v1231_v23, %v1218_v42  ;;  %v1245_v5 = vpop.f32.mrf.mxu1  ;;  %v3581_v56 = vld [vmem:[#allocation9 + $0x294] sm:$0xf]  ;;  %v3190_v1 = vor.u32 %v3585_v54, %v3189_v53  ;;  %v3157_v58 = vld [vmem:[#allocation9 + $0x250] sm:$0xf]  ;;  %v3135_v53 = vld [vmem:[#allocation9 + $0x238] sm:$0xf0] }
 0x117   :  { %v3194_v57 = vor.u32 %v3581_v56, %v3191_v40  ;;  %v3577_v42 = vld [vmem:[#allocation9 + $0x26c] sm:$0xf0] }
 0x118   :  { %v1272_v63 = vadd.f32 %v1271_v60, %v1258_v59  ;;  %v1246_v47 = vadd.f32 %v1245_v5, %v1232_v0  ;;  %v3573_v59 = vld [vmem:[#allocation9 + $0x254] sm:$0xf]  ;;  %v3158_v23 = vor.u32 %v3577_v42, %v3157_v58  ;;  %v3359_v5 = vld [vmem:[#allocation9 + $0x3f8] sm:$0xf0] }
 0x119   :  { %2223 = vmatpush.bf16.msrb.mxu0 %v2942_v61  ;;  %2251 = vmatpush.bf16.msrb.mxu2 %v2946_v27  ;;  %v3159_v60 = vld [vmem:[#allocation9 + $0x270] sm:$0xf0]  ;;  %v3125_v27 = vld [vmem:[#allocation9 + $0x210] sm:$0xf] }
 0x11a   :  { %1277 = vst [vmem:[%s3912_s4 + $0x8] sm:$0xff] %v1272_v63  ;;  %v3162_v61 = vor.u32 %v3573_v59, %v3159_v60  ;;  %v3127_v0 = vld [vmem:[#allocation9 + $0x230] sm:$0xf0] }
 0x11d   :  { %v1259_v52 = vpop.f32.mrf.mxu2  ;;  %2224 = vmatpush.bf16.msrb.mxu0 %v2910_v6  ;;  %2252 = vmatpush.bf16.msrb.mxu2 %v2914_v7  ;;  %v3126_v6 = vor.u32 %v3569_v62, %v3125_v27 }
 0x11e   :  { %v1260_v51 = vadd.f32 %v1259_v52, %v1246_v47  ;;  %v1273_v15 = vpop.f32.mrf.mxu3  ;;  %v3362_v47 = vor.u32 %v3622_v4, %v3359_v5  ;;  %v3327_v52 = vld [vmem:[#allocation9 + $0x3b8] sm:$0xf0] }
 0x120   :  { %v1274_v18 = vadd.f32 %v1273_v15, %v1260_v51  ;;  %v3330_v51 = vor.u32 %v3614_v11, %v3327_v52  ;;  %v3295_v15 = vld [vmem:[#allocation9 + $0x378] sm:$0xf0] }
 0x121   :  { %2225 = vmatpush.bf16.msrb.mxu0 %v2878_v16  ;;  %2253 = vmatpush.bf16.msrb.mxu2 %v2882_v17  ;;  %v3294_v16 = vor.u32 %v3610_v55, %v3293_v13  ;;  %v3298_v17 = vor.u32 %v3606_v14, %v3295_v15 }
 0x122   :  { %1279 = vst [vmem:[%s3912_s4 + $0x18] sm:$0xff] %v1274_v18  ;;  %v3848_v24 = vpack.c.bf16 %v1274_v18, %v1272_v63  ;;  %v3565_v63 = vld [vmem:[#allocation9 + $0x214] sm:$0xf]  ;;  %v3261_v18 = vld [vmem:[#allocation9 + $0x318] sm:$0xf] }
 0x123   :  { %v3130_v7 = vor.u32 %v3565_v63, %v3127_v0 }
 0x124   :  { %2072 = vmatmul.bf16.vlgmr.msra.gmra.mxu1 %v3848_v24  ;;  %2100 = vmatmul.bf16.vlgmr.msra.gmra.mxu3 %v3848_v24 }
 0x125   :  { %2176 = vmatpush.bf16.msra.mxu1 %v3350_v19  ;;  %2204 = vmatpush.bf16.msra.mxu3 %v3354_v20  ;;  %v3602_v19 = vld [vmem:[#allocation9 + $0x334] sm:$0xf0]  ;;  %v3598_v20 = vld [vmem:[#allocation9 + $0x31c] sm:$0xf] }
 0x126   :  { %2226 = vmatmul.bf16.vlgmr.msrb.gmra.mxu0 %v3834_v48  ;;  %2254 = vmatmul.bf16.vlgmr.msrb.gmra.mxu2 %v3834_v48  ;;  %v3222_v48 = vor.u32 %v3593_v45, %v3221_v44  ;;  %v3262_v22 = vor.u32 %v3602_v19, %v3261_v18  ;;  %v3266_v25 = vor.u32 %v3598_v20, %v3263_v21  ;;  %v3167_v44 = vld [vmem:[#allocation9 + $0x278] sm:$0xf0] }
 0x129   :  { %2177 = vmatpush.bf16.msra.mxu1 %v3318_v28  ;;  %2205 = vmatpush.bf16.msra.mxu3 %v3322_v29  ;;  %v3594_v28 = vld [vmem:[#allocation9 + $0x2f4] sm:$0xf0]  ;;  %v3590_v29 = vld [vmem:[#allocation9 + $0x2dc] sm:$0xf] }
 0x12a   :  { %v3230_v31 = vor.u32 %v3594_v28, %v3229_v26  ;;  %v3234_v32 = vor.u32 %v3590_v29, %v3231_v30 }
 0x12d   :  { %2178 = vmatpush.bf16.msra.mxu1 %v3286_v34  ;;  %2206 = vmatpush.bf16.msra.mxu3 %v3290_v35  ;;  %v3586_v34 = vld [vmem:[#allocation9 + $0x2b4] sm:$0xf0]  ;;  %v3582_v35 = vld [vmem:[#allocation9 + $0x29c] sm:$0xf] }
 0x12e   :  { %v3198_v37 = vor.u32 %v3586_v34, %v3197_v33  ;;  %v3202_v38 = vor.u32 %v3582_v35, %v3199_v36 }
 0x131   :  { %2179 = vmatpush.bf16.msra.mxu1 %v3254_v41  ;;  %2207 = vmatpush.bf16.msra.mxu3 %v3258_v43  ;;  %v3578_v41 = vld [vmem:[#allocation9 + $0x274] sm:$0xf0]  ;;  %v3574_v43 = vld [vmem:[#allocation9 + $0x25c] sm:$0xf] }
 0x132   :  { %v3166_v45 = vor.u32 %v3578_v41, %v3165_v39  ;;  %v3170_v46 = vor.u32 %v3574_v43, %v3167_v44 }
 0x134   :  { %2128 = vmatmul.bf16.vlgmr.msrb.gmra.mxu1 %v3848_v24  ;;  %2156 = vmatmul.bf16.vlgmr.msrb.gmra.mxu3 %v3848_v24 }
 0x135   :  { %2180 = vmatpush.bf16.msra.mxu1 %v3222_v48  ;;  %2208 = vmatpush.bf16.msra.mxu3 %v3226_v50  ;;  %v3570_v48 = vld [vmem:[#allocation9 + $0x234] sm:$0xf0]  ;;  %v3566_v50 = vld [vmem:[#allocation9 + $0x21c] sm:$0xf] }
 0x136   :  { %v3134_v54 = vor.u32 %v3570_v48, %v3133_v49  ;;  %v3138_v56 = vor.u32 %v3566_v50, %v3135_v53 }
 0x139   :  { %2181 = vmatpush.bf16.msra.mxu1 %v3190_v1  ;;  %2209 = vmatpush.bf16.msra.mxu3 %v3194_v57 }
 0x13d   :  { %2182 = vmatpush.bf16.msra.mxu1 %v3158_v23  ;;  %2210 = vmatpush.bf16.msra.mxu3 %v3162_v61 }
 0x141   :  { %2183 = vmatpush.bf16.msra.mxu1 %v3126_v6  ;;  %2211 = vmatpush.bf16.msra.mxu3 %v3130_v7 }
 0x144   :  { %2184 = vmatmul.bf16.vlgmr.msra.gmra.mxu1 %v3848_v24  ;;  %2212 = vmatmul.bf16.vlgmr.msra.gmra.mxu3 %v3848_v24 }
 0x145   :  { %2232 = vmatpush.bf16.msrb.mxu1 %v3358_v8  ;;  %2260 = vmatpush.bf16.msrb.mxu3 %v3362_v47 }
 0x149   :  { %2233 = vmatpush.bf16.msrb.mxu1 %v3326_v12  ;;  %2261 = vmatpush.bf16.msrb.mxu3 %v3330_v51 }
 0x14d   :  { %2234 = vmatpush.bf16.msrb.mxu1 %v3294_v16  ;;  %2262 = vmatpush.bf16.msrb.mxu3 %v3298_v17 }
 0x151   :  { %2235 = vmatpush.bf16.msrb.mxu1 %v3262_v22  ;;  %2263 = vmatpush.bf16.msrb.mxu3 %v3266_v25 }
 0x155   :  { %2236 = vmatpush.bf16.msrb.mxu1 %v3230_v31  ;;  %2264 = vmatpush.bf16.msrb.mxu3 %v3234_v32 }
 0x159   :  { %2237 = vmatpush.bf16.msrb.mxu1 %v3198_v37  ;;  %2265 = vmatpush.bf16.msrb.mxu3 %v3202_v38 }
 0x15d   :  { %2238 = vmatpush.bf16.msrb.mxu1 %v3166_v45  ;;  %2266 = vmatpush.bf16.msrb.mxu3 %v3170_v46 }
 0x161   :  { %2239 = vmatpush.bf16.msrb.mxu1 %v3134_v54  ;;  %2267 = vmatpush.bf16.msrb.mxu3 %v3138_v56  ;;  %v2059_v40 = vpop.f32.mrf.mxu0 }
 0x164   :  { %2240 = vmatmul.bf16.vlgmr.msrb.gmra.mxu1 %v3848_v24  ;;  %2268 = vmatmul.bf16.vlgmr.msrb.gmra.mxu3 %v3848_v24 }
 0x167   :  { %v2087_v1 = vpop.f32.mrf.mxu2 }
 0x169   :  { %v2061_v57 = vpop.f32.mrf.mxu0 }
 0x16f   :  { %v2089_v59 = vpop.f32.mrf.mxu2 }
 0x171   :  { %v2115_v62 = vpop.f32.mrf.mxu0 }
 0x177   :  { %v2143_v0 = vpop.f32.mrf.mxu2 }
 0x179   :  { %v2117_v4 = vpop.f32.mrf.mxu0 }
 0x17f   :  { %v2145_v47 = vpop.f32.mrf.mxu2 }
 0x181   :  { %v2171_v9 = vpop.f32.mrf.mxu0 }
 0x187   :  { %v2199_v51 = vpop.f32.mrf.mxu2 }
 0x189   :  { %v2173_v14 = vpop.f32.mrf.mxu0 }
 0x18f   :  { %v2201_v17 = vpop.f32.mrf.mxu2 }
 0x1a1   :  { %v2073_v58 = vpop.f32.mrf.mxu1 }
 0x1a2   :  { %v2074_v42 = vadd.f32 %v2073_v58, %v2059_v40 }
 0x1a3   :  { %v2227_v20 = vpop.f32.mrf.mxu0 }
 0x1a4   :  { %2274 = vst [vmem:[%s3913_s5] sm:$0xff] %v2074_v42 }
 0x1a7   :  { %v2101_v60 = vpop.f32.mrf.mxu3 }
 0x1a8   :  { %v2102_v23 = vadd.f32 %v2101_v60, %v2087_v1 }
 0x1a9   :  { %v2075_v61 = vpop.f32.mrf.mxu1  ;;  %v2255_v25 = vpop.f32.mrf.mxu2 }
 0x1aa   :  { %2275 = vst [vmem:[%s3913_s5 + $0x8] sm:$0xff] %v2102_v23  ;;  %v2076_v27 = vadd.f32 %v2075_v61, %v2061_v57 }
 0x1ab   :  { %v2229_v29 = vpop.f32.mrf.mxu0 }
 0x1ac   :  { %2282 = vst [vmem:[%s3913_s5 + $0x40] sm:$0xff] %v2076_v27 }
 0x1af   :  { %v2103_v24 = vpop.f32.mrf.mxu3 }
 0x1b0   :  { %v2104_v63 = vadd.f32 %v2103_v24, %v2089_v59 }
 0x1b1   :  { %v2129_v2 = vpop.f32.mrf.mxu1  ;;  %v2257_v32 = vpop.f32.mrf.mxu2 }
 0x1b2   :  { %2283 = vst [vmem:[%s3913_s5 + $0x48] sm:$0xff] %v2104_v63  ;;  %v2130_v3 = vadd.f32 %v2129_v2, %v2115_v62 }
 0x1b4   :  { %2276 = vst [vmem:[%s3913_s5 + $0x10] sm:$0xff] %v2130_v3 }
 0x1b7   :  { %v2157_v5 = vpop.f32.mrf.mxu3 }
 0x1b8   :  { %v2158_v6 = vadd.f32 %v2157_v5, %v2143_v0 }
 0x1b9   :  { %v2131_v7 = vpop.f32.mrf.mxu1 }
 0x1ba   :  { %2277 = vst [vmem:[%s3913_s5 + $0x18] sm:$0xff] %v2158_v6  ;;  %v2132_v8 = vadd.f32 %v2131_v7, %v2117_v4 }
 0x1bc   :  { %2284 = vst [vmem:[%s3913_s5 + $0x50] sm:$0xff] %v2132_v8 }
 0x1bf   :  { %v2159_v10 = vpop.f32.mrf.mxu3 }
 0x1c0   :  { %v2160_v11 = vadd.f32 %v2159_v10, %v2145_v47 }
 0x1c1   :  { %v2185_v52 = vpop.f32.mrf.mxu1 }
 0x1c2   :  { %2285 = vst [vmem:[%s3913_s5 + $0x58] sm:$0xff] %v2160_v11  ;;  %v2186_v12 = vadd.f32 %v2185_v52, %v2171_v9 }
 0x1c4   :  { %2278 = vst [vmem:[%s3913_s5 + $0x20] sm:$0xff] %v2186_v12 }
 0x1c7   :  { %v2213_v13 = vpop.f32.mrf.mxu3 }
 0x1c8   :  { %v2214_v55 = vadd.f32 %v2213_v13, %v2199_v51 }
 0x1c9   :  { %v2187_v15 = vpop.f32.mrf.mxu1 }
 0x1ca   :  { %2279 = vst [vmem:[%s3913_s5 + $0x28] sm:$0xff] %v2214_v55  ;;  %v2188_v16 = vadd.f32 %v2187_v15, %v2173_v14 }
 0x1cc   :  { %2286 = vst [vmem:[%s3913_s5 + $0x60] sm:$0xff] %v2188_v16 }
 0x1cf   :  { %v2215_v18 = vpop.f32.mrf.mxu3 }
 0x1d0   :  { %v2216_v19 = vadd.f32 %v2215_v18, %v2201_v17 }
 0x1d2   :  { %2287 = vst [vmem:[%s3913_s5 + $0x68] sm:$0xff] %v2216_v19 }
 0x1e1   :  { %v2241_v21 = vpop.f32.mrf.mxu1 }
 0x1e2   :  { %v2242_v22 = vadd.f32 %v2241_v21, %v2227_v20 }
 0x1e4   :  { %2280 = vst [vmem:[%s3913_s5 + $0x30] sm:$0xff] %v2242_v22 }
 0x1e7   :  { %v2269_v26 = vpop.f32.mrf.mxu3 }
 0x1e8   :  { %v2270_v28 = vadd.f32 %v2269_v26, %v2255_v25 }
 0x1e9   :  { %v2243_v30 = vpop.f32.mrf.mxu1 }
 0x1ea   :  { %2281 = vst [vmem:[%s3913_s5 + $0x38] sm:$0xff] %v2270_v28  ;;  %v2244_v31 = vadd.f32 %v2243_v30, %v2229_v29 }
 0x1ec   :  { %2288 = vst [vmem:[%s3913_s5 + $0x70] sm:$0xff] %v2244_v31 }
 0x1ef   :  { %v2271_v33 = vpop.f32.mrf.mxu3 }
 0x1f0   :  { %v2272_v34 = vadd.f32 %v2271_v33, %v2257_v32 }
 0x1f2   :  { %2289 = vst [vmem:[%s3913_s5 + $0x78] sm:$0xff] %v2272_v34 }
 0x1f3   :  { %2298 = vsyncpa [#allocation8], 1 }
 0x1f4   :  { %2299 = vsyncpa [#allocation10], 1 }

</bundles_post_ra>
